<compile_context>
chip_gen: v7x
topology: tpu7x:2x2x1
jax: 0.10.0
libtpu: 0.0.40
codegen_flags: <defaults>
</compile_context>

<pallas_src>
import functools

import jax
import jax.numpy as jnp
from jax.experimental import pallas as pl
from jax.experimental.pallas import tpu as pltpu


# ----------------------------- fused Pallas kernel ----------------------------- #
def _fused_gnn_kernel(x_ref, adj_ref, ohcn_ref, ohnc_ref, w_ref, b_ref, o_ref, *,
                      depth, convolutions, node_counts, layer_dims, w_offs,
                      a_offs, ohcn_offs, ohnc_offs):
    f32 = jnp.float32
    b_all = b_ref[...]                                   # (n_layers, 128) f32, tiny

    def get_w(l):
        cin, cout = layer_dims[l]
        off = w_offs[l]
        return w_ref[off:off + cin, :cout], cin, cout    # static, sublane-aligned slice

    def get_b(l, cout):
        return b_all[l:l + 1, :cout]

    def get_a(level):
        n, off = node_counts[level], a_offs[level]
        return adj_ref[off:off + n, :n]

    def conv(a, x, l, relu=True):
        # GCNConv: A_norm @ X @ W + b.  Matmul order picked by cin vs cout so the
        # dominant N^2*C term uses min(cin, cout).  a=None -> identity adjacency
        # (final conv: empty edge_index + default self-loops) -> plain dense layer.
        w, cin, cout = get_w(l)
        b = get_b(l, cout)
        if a is None:
            out = jnp.dot(x, w, preferred_element_type=f32) + b
        elif cin <= cout:
            out = jnp.dot(jnp.dot(a, x, preferred_element_type=f32), w,
                          preferred_element_type=f32) + b
        else:
            out = jnp.dot(a, jnp.dot(x, w, preferred_element_type=f32),
                          preferred_element_type=f32) + b
        return jnp.maximum(out, 0.0) if relu else out

    def up_conv(a, res, x_coarse, oh_nc, l):
        # First conv of an up block.  torch.cat((res, up), 1) @ W is rewritten with a
        # row-split weight (no lane-axis concat / relayout), and the index_select
        # unpool (up = OH_nc @ x_coarse) is fused by associativity:
        #   A @ (cat(res, OH@xc) @ W + b) = A @ (res@W_top + OH@(xc@W_bot)) + b
        cin, cout = layer_dims[l]
        off = w_offs[l]
        c_res = res.shape[1]
        w_top = w_ref[off:off + c_res, :cout]
        w_bot = w_ref[off + c_res:off + cin, :cout]
        b = get_b(l, cout)
        z = jnp.dot(res, w_top, preferred_element_type=f32)
        z = z + jnp.dot(oh_nc, jnp.dot(x_coarse, w_bot, preferred_element_type=f32),
                        preferred_element_type=f32)
        out = jnp.dot(a, z, preferred_element_type=f32) + b
        return jnp.maximum(out, 0.0)

    def seg_max(oh_cn, x):
        # max_pool_x: per-cluster max as a pairwise-tree reduction (VPU dependency
        # depth log2(Nf) instead of Nf).  Only an (Nc, C) accumulator is live.
        nf = x.shape[0]
        neg = -3.0e38
        terms = [jnp.where(oh_cn[:, j:j + 1] > 0.5, x[j:j + 1, :], neg)
                 for j in range(nf)]
        while len(terms) > 1:
            nxt = [jnp.maximum(terms[k], terms[k + 1])
                   for k in range(0, len(terms) - 1, 2)]
            if len(terms) % 2:
                nxt.append(terms[-1])
            terms = nxt
        # NOTE: an empty cluster would keep the -3e38 sentinel; PyG's max_pool_x
        # never produces one for a surjective cluster map (true for this hierarchy).
        return terms[0]

    x = x_ref[0, :, :]                                   # (N0, Cin) f32, one graph/step
    layer = 0

    # first block on the fine graph
    a = get_a(0)
    for _ in range(convolutions):
        x = conv(a, x, layer); layer += 1

    # encoder: pool + down blocks (residuals stay resident in vregs/VMEM)
    xs = []
    for i in range(depth):
        xs.append(x)
        nf, nc = node_counts[i], node_counts[i + 1]
        x = seg_max(ohcn_ref[ohcn_offs[i]:ohcn_offs[i] + nc, :nf], x)
        a = get_a(i + 1)
        for _ in range(convolutions):
            x = conv(a, x, layer); layer += 1

    # decoder: fused unpool + split-weight "concat" + up blocks
    # TODO(synk): at large Nf replace the one-hot unpool matmul with a scalar-prefetch
    # row gather (pl.Element index_map); it is O(Nf*Nc*C) here vs O(Nf*C) needed.
    for i in range(depth):
        j = depth - i - 1
        nf, nc = node_counts[j], node_counts[j + 1]
        oh_nc = ohnc_ref[ohnc_offs[j]:ohnc_offs[j] + nf, :nc]
        a = get_a(j)
        x = up_conv(a, xs[j], x, oh_nc, layer); layer += 1
        for _ in range(1, convolutions):
            x = conv(a, x, layer); layer += 1

    # final GCNConv(channels, 1): empty edge_index -> identity adjacency.  W and b are
    # zero-padded to 128 lanes in the slabs so this store is a full-lane vst; the host
    # slices column 0.
    o_ref[0, :, :] = conv(None, x, layer, relu=False)


# --------------------------------- wrapper ------------------------------------- #
def gnn_forward_fused(x, adjs, onehots_cn, onehots_nc, params, *, depth, convolutions):
    # x: (B, N0, Cin) -- B independent graphs sharing the same mesh hierarchy, which
    # matches the PyTorch module's buildBatch/checkCluster tiling behaviour.
    #
    # TODO(synk): for large N this must become a tiled, pipelined grid (row tiles
    # "parallel", reduction axis "arbitrary"); budget tiles for v7x's 64 MiB VMEM and
    # stream A as bf16 (int8 on v5e/v6e, fp8 on v7x).  At N=16 one call per graph with
    # whole-array VMEM blocks is optimal (launch/DMA overhead dominates).
    B, N0, cin0 = x.shape
    node_counts = [a.shape[0] for a in adjs]
    n_layers = len(params)
    layer_dims = [(w.shape[0], w.shape[1]) for (w, _) in params]

    out_pad = 128
    w_width = max(out_pad, max(co for _, co in layer_dims))

    # ---- pack the ~30 tiny inputs into a handful of grid-invariant slabs ---------- #
    def pack_rows(mats, min_width=0, align=8):
        width = max(min_width, max(m.shape[1] for m in mats))
        offs, rows = [], 0
        for m in mats:
            offs.append(rows)
            rows += -(-m.shape[0] // align) * align       # sublane-aligned row blocks
        slab = jnp.zeros((rows, width), jnp.float32)
        for m, off in zip(mats, offs):
            slab = slab.at[off:off + m.shape[0], :m.shape[1]].set(m.astype(jnp.float32))
        return slab, tuple(offs)

    adj_slab, a_offs = pack_rows(adjs)
    ohcn_slab, ohcn_offs = pack_rows(onehots_cn)
    ohnc_slab, ohnc_offs = pack_rows(onehots_nc)
    w_slab, w_offs = pack_rows([w for (w, _) in params], min_width=w_width)
    b_slab = jnp.zeros((n_layers, w_width), jnp.float32)
    for l, (_, b) in enumerate(params):
        b_slab = b_slab.at[l, :b.shape[0]].set(b.astype(jnp.float32))

    # kernel-visible cout of the final conv is lane-padded to 128 (slab cols are zero)
    layer_dims = list(layer_dims)
    layer_dims[-1] = (layer_dims[-1][0], out_pad)

    kernel = functools.partial(
        _fused_gnn_kernel,
        depth=depth, convolutions=convolutions,
        node_counts=tuple(node_counts), layer_dims=tuple(layer_dims),
        w_offs=w_offs, a_offs=a_offs, ohcn_offs=ohcn_offs, ohnc_offs=ohnc_offs)

    def invariant(shape):
        return pl.BlockSpec(shape, lambda b: (0,) * len(shape))

    out = pl.pallas_call(
        kernel,
        out_shape=jax.ShapeDtypeStruct((B, N0, out_pad), jnp.float32),
        grid=(B,),
        in_specs=[
            pl.BlockSpec((1, N0, cin0), lambda b: (b, 0, 0)),   # per-graph features
            invariant(adj_slab.shape),                          # grid-invariant slabs
            invariant(ohcn_slab.shape),
            invariant(ohnc_slab.shape),
            invariant(w_slab.shape),
            invariant(b_slab.shape),
        ],
        out_specs=pl.BlockSpec((1, N0, out_pad), lambda b: (b, 0, 0)),
        compiler_params=pltpu.CompilerParams(dimension_semantics=("parallel",)),
    )(x.astype(jnp.float32), adj_slab, ohcn_slab, ohnc_slab, w_slab, b_slab)
    return out[..., :1]                                         # lane-dense store, host slice


# --------------------------------- JAX glue ------------------------------------ #
def chain_edge_index(n):
    src = jnp.concatenate([jnp.arange(n - 1), jnp.arange(1, n)])
    dst = jnp.concatenate([jnp.arange(1, n), jnp.arange(n - 1)])
    return jnp.stack([src, dst]).astype(jnp.int32)


def gcn_norm_adj(edge_index, n):
    # PyG GCNConv gcn_norm with add_self_loops=True, unit edge weights.
    A = jnp.zeros((n, n), jnp.float32)
    if edge_index.shape[1] > 0:
        src, dst = edge_index[0], edge_index[1]
        A = A.at[dst, src].add(1.0)
    A = A + jnp.eye(n, dtype=jnp.float32)
    dinv = 1.0 / jnp.sqrt(A.sum(axis=1))
    return dinv[:, None] * A * dinv[None, :]


def glorot(key, cin, cout):
    a = (6.0 / (cin + cout)) ** 0.5
    return jax.random.uniform(key, (cin, cout), jnp.float32, -a, a)


def init_params_flat(key, channels_in, channels, convolutions, depth):
    # layer order must match the kernel: first block, down blocks, up blocks, final.
    def block_dims(cin, cout):
        dims = []
        for _ in range(convolutions):
            dims.append((cin, cout))
            cin = cout
        return dims

    layer_dims = block_dims(channels_in, channels)
    cout = channels
    for _ in range(depth):
        cin, cout = cout, cout * 2
        layer_dims += block_dims(cin, cout)
    for _ in range(depth):
        cin, cout = cout, cout // 2
        layer_dims += block_dims(cin + cout, cout)
    layer_dims.append((channels, 1))  # final_conv

    params = []
    for (ci, co) in layer_dims:
        key, k = jax.random.split(key)
        params.append((glorot(k, ci, co), jnp.zeros((co,), jnp.float32)))
    return params


# ----------------------------------- main --------------------------------------- #
if __name__ == "__main__":
    # gnnModel(channels_in=4, channels=8, convolutions=2, depth=2, loss_function=None)
    # TODO(synk): loss_function is stored but unused in forward; not implemented.
    channels_in, channels, convolutions, depth = 4, 8, 2, 2
    B, N0 = 2, 16
    node_counts = [N0 // (2 ** l) for l in range(depth + 1)]  # [16, 8, 4]

    key = jax.random.PRNGKey(0)
    key, kx = jax.random.split(key)
    x = jax.random.normal(kx, (B, N0, channels_in), jnp.float32)

    # Synthetic mesh hierarchy (the PyTorch module expects external Clusters / Edges):
    # deterministic chain graphs, pairwise clustering, identical for every graph in the
    # batch (this is exactly what checkCluster's tiling assumes).
    clusters = [jnp.arange(node_counts[l], dtype=jnp.int32) // 2 for l in range(depth)]
    edges = [chain_edge_index(node_counts[l]) for l in range(depth + 1)]
    adjs = [gcn_norm_adj(edges[l], node_counts[l]) for l in range(depth + 1)]

    # Both one-hot orientations built directly from the cluster ids:
    #   cluster->node [Nc, Nf] for the pooling max, node->cluster [Nf, Nc] for the
    #   index_select unpool matmul.
    onehots_cn = [
        (jnp.arange(node_counts[l + 1])[:, None] == clusters[l][None, :]).astype(jnp.float32)
        for l in range(depth)
    ]
    onehots_nc = [
        (clusters[l][:, None] == jnp.arange(node_counts[l + 1])[None, :]).astype(jnp.float32)
        for l in range(depth)
    ]

    params = init_params_flat(key, channels_in, channels, convolutions, depth)

    out = gnn_forward_fused(
        x, adjs, onehots_cn, onehots_nc, params, depth=depth, convolutions=convolutions
    )
    jax.block_until_ready(out)
    assert out.shape == (B, N0, 1) and out.dtype == jnp.float32
    print("KERNEL_OK")
</pallas_src>

<mosaic_0001>
module attributes {stable_mosaic.version = 11 : i64} {
  func.func @_fused_gnn_kernel(%arg0: i32, %arg1: memref<1x16x4xf32, #tpu.memory_space<vmem>>, %arg2: memref<32x16xf32, #tpu.memory_space<vmem>>, %arg3: memref<16x16xf32, #tpu.memory_space<vmem>>, %arg4: memref<24x8xf32, #tpu.memory_space<vmem>>, %arg5: memref<192x128xf32, #tpu.memory_space<vmem>>, %arg6: memref<11x128xf32, #tpu.memory_space<vmem>>, %arg7: memref<1x16x128xf32, #tpu.memory_space<vmem>>) attributes {dimension_semantics = [#tpu.dimension_semantics<parallel>], iteration_bounds = array<i64: 2>, scalar_prefetch = 0 : i64, scratch_operands = 0 : i64, tpu.core_type = #tpu.core_type<tc>, window_params = [{transform_indices = @transform_0, window_bounds = array<i64: 1, 16, 4>}, {pipeline_mode = #tpu.pipeline_mode<synchronous>, transform_indices = @transform_1, window_bounds = array<i64: 32, 16>}, {pipeline_mode = #tpu.pipeline_mode<synchronous>, transform_indices = @transform_2, window_bounds = array<i64: 16, 16>}, {pipeline_mode = #tpu.pipeline_mode<synchronous>, transform_indices = @transform_3, window_bounds = array<i64: 24, 8>}, {pipeline_mode = #tpu.pipeline_mode<synchronous>, transform_indices = @transform_4, window_bounds = array<i64: 192, 128>}, {pipeline_mode = #tpu.pipeline_mode<synchronous>, transform_indices = @transform_5, window_bounds = array<i64: 11, 128>}, {transform_indices = @transform_6, window_bounds = array<i64: 1, 16, 128>}]} {
    %c0 = arith.constant 0 : index
    %c0_0 = arith.constant 0 : index
    %0 = vector.load %arg6[%c0, %c0_0] : memref<11x128xf32, #tpu.memory_space<vmem>>, vector<11x128xf32>
    %c0_1 = arith.constant 0 : index
    %c0_2 = arith.constant 0 : index
    %c0_3 = arith.constant 0 : index
    %1 = vector.load %arg1[%c0_1, %c0_2, %c0_3] : memref<1x16x4xf32, #tpu.memory_space<vmem>>, vector<1x16x4xf32>
    %2 = vector.shape_cast %1 : vector<1x16x4xf32> to vector<16x4xf32>
    %c0_4 = arith.constant 0 : index
    %c0_5 = arith.constant 0 : index
    %3 = vector.load %arg2[%c0_4, %c0_5] : memref<32x16xf32, #tpu.memory_space<vmem>>, vector<16x16xf32>
    %c0_6 = arith.constant 0 : index
    %c0_7 = arith.constant 0 : index
    %4 = vector.load %arg5[%c0_6, %c0_7] : memref<192x128xf32, #tpu.memory_space<vmem>>, vector<4x8xf32>
    %5 = vector.extract_strided_slice %0 {offsets = [0, 0], sizes = [1, 8], strides = [1, 1]} : vector<11x128xf32> to vector<1x8xf32>
    %cst = arith.constant dense<0.000000e+00> : vector<16x4xf32>
    %6 = tpu.matmul %3, %2, %cst {dimension_numbers = #tpu.dot_dimension_numbers<[1], [0], [0], [1], [0, 0, 1, 1], [], []>} : vector<16x16xf32>, vector<16x4xf32>, vector<16x4xf32> -> vector<16x4xf32>
    %cst_8 = arith.constant dense<0.000000e+00> : vector<16x8xf32>
    %7 = tpu.matmul %6, %4, %cst_8 {dimension_numbers = #tpu.dot_dimension_numbers<[1], [0], [0], [1], [0, 0, 1, 1], [], []>} : vector<16x4xf32>, vector<4x8xf32>, vector<16x8xf32> -> vector<16x8xf32>
    %8 = vector.broadcast %5 : vector<1x8xf32> to vector<16x8xf32>
    %9 = arith.addf %7, %8 : vector<16x8xf32>
    %cst_9 = arith.constant 0.000000e+00 : f32
    %10 = vector.broadcast %cst_9 : f32 to vector<16x8xf32>
    %11 = arith.maximumf %9, %10 : vector<16x8xf32>
    %c8 = arith.constant 8 : index
    %c0_10 = arith.constant 0 : index
    %12 = vector.load %arg5[%c8, %c0_10] : memref<192x128xf32, #tpu.memory_space<vmem>>, vector<8x8xf32>
    %13 = vector.extract_strided_slice %0 {offsets = [1, 0], sizes = [1, 8], strides = [1, 1]} : vector<11x128xf32> to vector<1x8xf32>
    %cst_11 = arith.constant dense<0.000000e+00> : vector<16x8xf32>
    %14 = tpu.matmul %3, %11, %cst_11 {dimension_numbers = #tpu.dot_dimension_numbers<[1], [0], [0], [1], [0, 0, 1, 1], [], []>} : vector<16x16xf32>, vector<16x8xf32>, vector<16x8xf32> -> vector<16x8xf32>
    %cst_12 = arith.constant dense<0.000000e+00> : vector<16x8xf32>
    %15 = tpu.matmul %14, %12, %cst_12 {dimension_numbers = #tpu.dot_dimension_numbers<[1], [0], [0], [1], [0, 0, 1, 1], [], []>} : vector<16x8xf32>, vector<8x8xf32>, vector<16x8xf32> -> vector<16x8xf32>
    %16 = vector.broadcast %13 : vector<1x8xf32> to vector<16x8xf32>
    %17 = arith.addf %15, %16 : vector<16x8xf32>
    %cst_13 = arith.constant 0.000000e+00 : f32
    %18 = vector.broadcast %cst_13 : f32 to vector<16x8xf32>
    %19 = arith.maximumf %17, %18 : vector<16x8xf32>
    %c0_14 = arith.constant 0 : index
    %c0_15 = arith.constant 0 : index
    %20 = vector.load %arg3[%c0_14, %c0_15] : memref<16x16xf32, #tpu.memory_space<vmem>>, vector<8x16xf32>
    %21 = vector.extract_strided_slice %20 {offsets = [0, 0], sizes = [8, 1], strides = [1, 1]} : vector<8x16xf32> to vector<8x1xf32>
    %cst_16 = arith.constant 5.000000e-01 : f32
    %22 = vector.broadcast %cst_16 : f32 to vector<8x1xf32>
    %23 = arith.cmpf ogt, %21, %22 : vector<8x1xf32>
    %24 = vector.extract_strided_slice %19 {offsets = [0, 0], sizes = [1, 8], strides = [1, 1]} : vector<16x8xf32> to vector<1x8xf32>
    %cst_17 = arith.constant -3.000000e+38 : f32
    %25 = vector.shape_cast %23 : vector<8x1xi1> to vector<8x1xi1>
    %26 = vector.broadcast %25 : vector<8x1xi1> to vector<8x8xi1>
    %27 = vector.shape_cast %24 : vector<1x8xf32> to vector<1x8xf32>
    %28 = vector.broadcast %27 : vector<1x8xf32> to vector<8x8xf32>
    %29 = vector.broadcast %cst_17 : f32 to vector<8x8xf32>
    %30 = arith.select %26, %28, %29 : vector<8x8xi1>, vector<8x8xf32>
    %31 = vector.extract_strided_slice %20 {offsets = [0, 1], sizes = [8, 1], strides = [1, 1]} : vector<8x16xf32> to vector<8x1xf32>
    %cst_18 = arith.constant 5.000000e-01 : f32
    %32 = vector.broadcast %cst_18 : f32 to vector<8x1xf32>
    %33 = arith.cmpf ogt, %31, %32 : vector<8x1xf32>
    %34 = vector.extract_strided_slice %19 {offsets = [1, 0], sizes = [1, 8], strides = [1, 1]} : vector<16x8xf32> to vector<1x8xf32>
    %cst_19 = arith.constant -3.000000e+38 : f32
    %35 = vector.shape_cast %33 : vector<8x1xi1> to vector<8x1xi1>
    %36 = vector.broadcast %35 : vector<8x1xi1> to vector<8x8xi1>
    %37 = vector.shape_cast %34 : vector<1x8xf32> to vector<1x8xf32>
    %38 = vector.broadcast %37 : vector<1x8xf32> to vector<8x8xf32>
    %39 = vector.broadcast %cst_19 : f32 to vector<8x8xf32>
    %40 = arith.select %36, %38, %39 : vector<8x8xi1>, vector<8x8xf32>
    %41 = vector.extract_strided_slice %20 {offsets = [0, 2], sizes = [8, 1], strides = [1, 1]} : vector<8x16xf32> to vector<8x1xf32>
    %cst_20 = arith.constant 5.000000e-01 : f32
    %42 = vector.broadcast %cst_20 : f32 to vector<8x1xf32>
    %43 = arith.cmpf ogt, %41, %42 : vector<8x1xf32>
    %44 = vector.extract_strided_slice %19 {offsets = [2, 0], sizes = [1, 8], strides = [1, 1]} : vector<16x8xf32> to vector<1x8xf32>
    %cst_21 = arith.constant -3.000000e+38 : f32
    %45 = vector.shape_cast %43 : vector<8x1xi1> to vector<8x1xi1>
    %46 = vector.broadcast %45 : vector<8x1xi1> to vector<8x8xi1>
    %47 = vector.shape_cast %44 : vector<1x8xf32> to vector<1x8xf32>
    %48 = vector.broadcast %47 : vector<1x8xf32> to vector<8x8xf32>
    %49 = vector.broadcast %cst_21 : f32 to vector<8x8xf32>
    %50 = arith.select %46, %48, %49 : vector<8x8xi1>, vector<8x8xf32>
    %51 = vector.extract_strided_slice %20 {offsets = [0, 3], sizes = [8, 1], strides = [1, 1]} : vector<8x16xf32> to vector<8x1xf32>
    %cst_22 = arith.constant 5.000000e-01 : f32
    %52 = vector.broadcast %cst_22 : f32 to vector<8x1xf32>
    %53 = arith.cmpf ogt, %51, %52 : vector<8x1xf32>
    %54 = vector.extract_strided_slice %19 {offsets = [3, 0], sizes = [1, 8], strides = [1, 1]} : vector<16x8xf32> to vector<1x8xf32>
    %cst_23 = arith.constant -3.000000e+38 : f32
    %55 = vector.shape_cast %53 : vector<8x1xi1> to vector<8x1xi1>
    %56 = vector.broadcast %55 : vector<8x1xi1> to vector<8x8xi1>
    %57 = vector.shape_cast %54 : vector<1x8xf32> to vector<1x8xf32>
    %58 = vector.broadcast %57 : vector<1x8xf32> to vector<8x8xf32>
    %59 = vector.broadcast %cst_23 : f32 to vector<8x8xf32>
    %60 = arith.select %56, %58, %59 : vector<8x8xi1>, vector<8x8xf32>
    %61 = vector.extract_strided_slice %20 {offsets = [0, 4], sizes = [8, 1], strides = [1, 1]} : vector<8x16xf32> to vector<8x1xf32>
    %cst_24 = arith.constant 5.000000e-01 : f32
    %62 = vector.broadcast %cst_24 : f32 to vector<8x1xf32>
    %63 = arith.cmpf ogt, %61, %62 : vector<8x1xf32>
    %64 = vector.extract_strided_slice %19 {offsets = [4, 0], sizes = [1, 8], strides = [1, 1]} : vector<16x8xf32> to vector<1x8xf32>
    %cst_25 = arith.constant -3.000000e+38 : f32
    %65 = vector.shape_cast %63 : vector<8x1xi1> to vector<8x1xi1>
    %66 = vector.broadcast %65 : vector<8x1xi1> to vector<8x8xi1>
    %67 = vector.shape_cast %64 : vector<1x8xf32> to vector<1x8xf32>
    %68 = vector.broadcast %67 : vector<1x8xf32> to vector<8x8xf32>
    %69 = vector.broadcast %cst_25 : f32 to vector<8x8xf32>
    %70 = arith.select %66, %68, %69 : vector<8x8xi1>, vector<8x8xf32>
    %71 = vector.extract_strided_slice %20 {offsets = [0, 5], sizes = [8, 1], strides = [1, 1]} : vector<8x16xf32> to vector<8x1xf32>
    %cst_26 = arith.constant 5.000000e-01 : f32
    %72 = vector.broadcast %cst_26 : f32 to vector<8x1xf32>
    %73 = arith.cmpf ogt, %71, %72 : vector<8x1xf32>
    %74 = vector.extract_strided_slice %19 {offsets = [5, 0], sizes = [1, 8], strides = [1, 1]} : vector<16x8xf32> to vector<1x8xf32>
    %cst_27 = arith.constant -3.000000e+38 : f32
    %75 = vector.shape_cast %73 : vector<8x1xi1> to vector<8x1xi1>
    %76 = vector.broadcast %75 : vector<8x1xi1> to vector<8x8xi1>
    %77 = vector.shape_cast %74 : vector<1x8xf32> to vector<1x8xf32>
    %78 = vector.broadcast %77 : vector<1x8xf32> to vector<8x8xf32>
    %79 = vector.broadcast %cst_27 : f32 to vector<8x8xf32>
    %80 = arith.select %76, %78, %79 : vector<8x8xi1>, vector<8x8xf32>
    %81 = vector.extract_strided_slice %20 {offsets = [0, 6], sizes = [8, 1], strides = [1, 1]} : vector<8x16xf32> to vector<8x1xf32>
    %cst_28 = arith.constant 5.000000e-01 : f32
    %82 = vector.broadcast %cst_28 : f32 to vector<8x1xf32>
    %83 = arith.cmpf ogt, %81, %82 : vector<8x1xf32>
    %84 = vector.extract_strided_slice %19 {offsets = [6, 0], sizes = [1, 8], strides = [1, 1]} : vector<16x8xf32> to vector<1x8xf32>
    %cst_29 = arith.constant -3.000000e+38 : f32
    %85 = vector.shape_cast %83 : vector<8x1xi1> to vector<8x1xi1>
    %86 = vector.broadcast %85 : vector<8x1xi1> to vector<8x8xi1>
    %87 = vector.shape_cast %84 : vector<1x8xf32> to vector<1x8xf32>
    %88 = vector.broadcast %87 : vector<1x8xf32> to vector<8x8xf32>
    %89 = vector.broadcast %cst_29 : f32 to vector<8x8xf32>
    %90 = arith.select %86, %88, %89 : vector<8x8xi1>, vector<8x8xf32>
    %91 = vector.extract_strided_slice %20 {offsets = [0, 7], sizes = [8, 1], strides = [1, 1]} : vector<8x16xf32> to vector<8x1xf32>
    %cst_30 = arith.constant 5.000000e-01 : f32
    %92 = vector.broadcast %cst_30 : f32 to vector<8x1xf32>
    %93 = arith.cmpf ogt, %91, %92 : vector<8x1xf32>
    %94 = vector.extract_strided_slice %19 {offsets = [7, 0], sizes = [1, 8], strides = [1, 1]} : vector<16x8xf32> to vector<1x8xf32>
    %cst_31 = arith.constant -3.000000e+38 : f32
    %95 = vector.shape_cast %93 : vector<8x1xi1> to vector<8x1xi1>
    %96 = vector.broadcast %95 : vector<8x1xi1> to vector<8x8xi1>
    %97 = vector.shape_cast %94 : vector<1x8xf32> to vector<1x8xf32>
    %98 = vector.broadcast %97 : vector<1x8xf32> to vector<8x8xf32>
    %99 = vector.broadcast %cst_31 : f32 to vector<8x8xf32>
    %100 = arith.select %96, %98, %99 : vector<8x8xi1>, vector<8x8xf32>
    %101 = vector.extract_strided_slice %20 {offsets = [0, 8], sizes = [8, 1], strides = [1, 1]} : vector<8x16xf32> to vector<8x1xf32>
    %cst_32 = arith.constant 5.000000e-01 : f32
    %102 = vector.broadcast %cst_32 : f32 to vector<8x1xf32>
    %103 = arith.cmpf ogt, %101, %102 : vector<8x1xf32>
    %104 = vector.extract_strided_slice %19 {offsets = [8, 0], sizes = [1, 8], strides = [1, 1]} : vector<16x8xf32> to vector<1x8xf32>
    %cst_33 = arith.constant -3.000000e+38 : f32
    %105 = vector.shape_cast %103 : vector<8x1xi1> to vector<8x1xi1>
    %106 = vector.broadcast %105 : vector<8x1xi1> to vector<8x8xi1>
    %107 = vector.shape_cast %104 : vector<1x8xf32> to vector<1x8xf32>
    %108 = vector.broadcast %107 : vector<1x8xf32> to vector<8x8xf32>
    %109 = vector.broadcast %cst_33 : f32 to vector<8x8xf32>
    %110 = arith.select %106, %108, %109 : vector<8x8xi1>, vector<8x8xf32>
    %111 = vector.extract_strided_slice %20 {offsets = [0, 9], sizes = [8, 1], strides = [1, 1]} : vector<8x16xf32> to vector<8x1xf32>
    %cst_34 = arith.constant 5.000000e-01 : f32
    %112 = vector.broadcast %cst_34 : f32 to vector<8x1xf32>
    %113 = arith.cmpf ogt, %111, %112 : vector<8x1xf32>
    %114 = vector.extract_strided_slice %19 {offsets = [9, 0], sizes = [1, 8], strides = [1, 1]} : vector<16x8xf32> to vector<1x8xf32>
    %cst_35 = arith.constant -3.000000e+38 : f32
    %115 = vector.shape_cast %113 : vector<8x1xi1> to vector<8x1xi1>
    %116 = vector.broadcast %115 : vector<8x1xi1> to vector<8x8xi1>
    %117 = vector.shape_cast %114 : vector<1x8xf32> to vector<1x8xf32>
    %118 = vector.broadcast %117 : vector<1x8xf32> to vector<8x8xf32>
    %119 = vector.broadcast %cst_35 : f32 to vector<8x8xf32>
    %120 = arith.select %116, %118, %119 : vector<8x8xi1>, vector<8x8xf32>
    %121 = vector.extract_strided_slice %20 {offsets = [0, 10], sizes = [8, 1], strides = [1, 1]} : vector<8x16xf32> to vector<8x1xf32>
    %cst_36 = arith.constant 5.000000e-01 : f32
    %122 = vector.broadcast %cst_36 : f32 to vector<8x1xf32>
    %123 = arith.cmpf ogt, %121, %122 : vector<8x1xf32>
    %124 = vector.extract_strided_slice %19 {offsets = [10, 0], sizes = [1, 8], strides = [1, 1]} : vector<16x8xf32> to vector<1x8xf32>
    %cst_37 = arith.constant -3.000000e+38 : f32
    %125 = vector.shape_cast %123 : vector<8x1xi1> to vector<8x1xi1>
    %126 = vector.broadcast %125 : vector<8x1xi1> to vector<8x8xi1>
    %127 = vector.shape_cast %124 : vector<1x8xf32> to vector<1x8xf32>
    %128 = vector.broadcast %127 : vector<1x8xf32> to vector<8x8xf32>
    %129 = vector.broadcast %cst_37 : f32 to vector<8x8xf32>
    %130 = arith.select %126, %128, %129 : vector<8x8xi1>, vector<8x8xf32>
    %131 = vector.extract_strided_slice %20 {offsets = [0, 11], sizes = [8, 1], strides = [1, 1]} : vector<8x16xf32> to vector<8x1xf32>
    %cst_38 = arith.constant 5.000000e-01 : f32
    %132 = vector.broadcast %cst_38 : f32 to vector<8x1xf32>
    %133 = arith.cmpf ogt, %131, %132 : vector<8x1xf32>
    %134 = vector.extract_strided_slice %19 {offsets = [11, 0], sizes = [1, 8], strides = [1, 1]} : vector<16x8xf32> to vector<1x8xf32>
    %cst_39 = arith.constant -3.000000e+38 : f32
    %135 = vector.shape_cast %133 : vector<8x1xi1> to vector<8x1xi1>
    %136 = vector.broadcast %135 : vector<8x1xi1> to vector<8x8xi1>
    %137 = vector.shape_cast %134 : vector<1x8xf32> to vector<1x8xf32>
    %138 = vector.broadcast %137 : vector<1x8xf32> to vector<8x8xf32>
    %139 = vector.broadcast %cst_39 : f32 to vector<8x8xf32>
    %140 = arith.select %136, %138, %139 : vector<8x8xi1>, vector<8x8xf32>
    %141 = vector.extract_strided_slice %20 {offsets = [0, 12], sizes = [8, 1], strides = [1, 1]} : vector<8x16xf32> to vector<8x1xf32>
    %cst_40 = arith.constant 5.000000e-01 : f32
    %142 = vector.broadcast %cst_40 : f32 to vector<8x1xf32>
    %143 = arith.cmpf ogt, %141, %142 : vector<8x1xf32>
    %144 = vector.extract_strided_slice %19 {offsets = [12, 0], sizes = [1, 8], strides = [1, 1]} : vector<16x8xf32> to vector<1x8xf32>
    %cst_41 = arith.constant -3.000000e+38 : f32
    %145 = vector.shape_cast %143 : vector<8x1xi1> to vector<8x1xi1>
    %146 = vector.broadcast %145 : vector<8x1xi1> to vector<8x8xi1>
    %147 = vector.shape_cast %144 : vector<1x8xf32> to vector<1x8xf32>
    %148 = vector.broadcast %147 : vector<1x8xf32> to vector<8x8xf32>
    %149 = vector.broadcast %cst_41 : f32 to vector<8x8xf32>
    %150 = arith.select %146, %148, %149 : vector<8x8xi1>, vector<8x8xf32>
    %151 = vector.extract_strided_slice %20 {offsets = [0, 13], sizes = [8, 1], strides = [1, 1]} : vector<8x16xf32> to vector<8x1xf32>
    %cst_42 = arith.constant 5.000000e-01 : f32
    %152 = vector.broadcast %cst_42 : f32 to vector<8x1xf32>
    %153 = arith.cmpf ogt, %151, %152 : vector<8x1xf32>
    %154 = vector.extract_strided_slice %19 {offsets = [13, 0], sizes = [1, 8], strides = [1, 1]} : vector<16x8xf32> to vector<1x8xf32>
    %cst_43 = arith.constant -3.000000e+38 : f32
    %155 = vector.shape_cast %153 : vector<8x1xi1> to vector<8x1xi1>
    %156 = vector.broadcast %155 : vector<8x1xi1> to vector<8x8xi1>
    %157 = vector.shape_cast %154 : vector<1x8xf32> to vector<1x8xf32>
    %158 = vector.broadcast %157 : vector<1x8xf32> to vector<8x8xf32>
    %159 = vector.broadcast %cst_43 : f32 to vector<8x8xf32>
    %160 = arith.select %156, %158, %159 : vector<8x8xi1>, vector<8x8xf32>
    %161 = vector.extract_strided_slice %20 {offsets = [0, 14], sizes = [8, 1], strides = [1, 1]} : vector<8x16xf32> to vector<8x1xf32>
    %cst_44 = arith.constant 5.000000e-01 : f32
    %162 = vector.broadcast %cst_44 : f32 to vector<8x1xf32>
    %163 = arith.cmpf ogt, %161, %162 : vector<8x1xf32>
    %164 = vector.extract_strided_slice %19 {offsets = [14, 0], sizes = [1, 8], strides = [1, 1]} : vector<16x8xf32> to vector<1x8xf32>
    %cst_45 = arith.constant -3.000000e+38 : f32
    %165 = vector.shape_cast %163 : vector<8x1xi1> to vector<8x1xi1>
    %166 = vector.broadcast %165 : vector<8x1xi1> to vector<8x8xi1>
    %167 = vector.shape_cast %164 : vector<1x8xf32> to vector<1x8xf32>
    %168 = vector.broadcast %167 : vector<1x8xf32> to vector<8x8xf32>
    %169 = vector.broadcast %cst_45 : f32 to vector<8x8xf32>
    %170 = arith.select %166, %168, %169 : vector<8x8xi1>, vector<8x8xf32>
    %171 = vector.extract_strided_slice %20 {offsets = [0, 15], sizes = [8, 1], strides = [1, 1]} : vector<8x16xf32> to vector<8x1xf32>
    %cst_46 = arith.constant 5.000000e-01 : f32
    %172 = vector.broadcast %cst_46 : f32 to vector<8x1xf32>
    %173 = arith.cmpf ogt, %171, %172 : vector<8x1xf32>
    %174 = vector.extract_strided_slice %19 {offsets = [15, 0], sizes = [1, 8], strides = [1, 1]} : vector<16x8xf32> to vector<1x8xf32>
    %cst_47 = arith.constant -3.000000e+38 : f32
    %175 = vector.shape_cast %173 : vector<8x1xi1> to vector<8x1xi1>
    %176 = vector.broadcast %175 : vector<8x1xi1> to vector<8x8xi1>
    %177 = vector.shape_cast %174 : vector<1x8xf32> to vector<1x8xf32>
    %178 = vector.broadcast %177 : vector<1x8xf32> to vector<8x8xf32>
    %179 = vector.broadcast %cst_47 : f32 to vector<8x8xf32>
    %180 = arith.select %176, %178, %179 : vector<8x8xi1>, vector<8x8xf32>
    %181 = arith.maximumf %30, %40 : vector<8x8xf32>
    %182 = arith.maximumf %50, %60 : vector<8x8xf32>
    %183 = arith.maximumf %70, %80 : vector<8x8xf32>
    %184 = arith.maximumf %90, %100 : vector<8x8xf32>
    %185 = arith.maximumf %110, %120 : vector<8x8xf32>
    %186 = arith.maximumf %130, %140 : vector<8x8xf32>
    %187 = arith.maximumf %150, %160 : vector<8x8xf32>
    %188 = arith.maximumf %170, %180 : vector<8x8xf32>
    %189 = arith.maximumf %181, %182 : vector<8x8xf32>
    %190 = arith.maximumf %183, %184 : vector<8x8xf32>
    %191 = arith.maximumf %185, %186 : vector<8x8xf32>
    %192 = arith.maximumf %187, %188 : vector<8x8xf32>
    %193 = arith.maximumf %189, %190 : vector<8x8xf32>
    %194 = arith.maximumf %191, %192 : vector<8x8xf32>
    %195 = arith.maximumf %193, %194 : vector<8x8xf32>
    %c16 = arith.constant 16 : index
    %c0_48 = arith.constant 0 : index
    %196 = vector.load %arg2[%c16, %c0_48] : memref<32x16xf32, #tpu.memory_space<vmem>>, vector<8x8xf32>
    %c16_49 = arith.constant 16 : index
    %c0_50 = arith.constant 0 : index
    %197 = vector.load %arg5[%c16_49, %c0_50] : memref<192x128xf32, #tpu.memory_space<vmem>>, vector<8x16xf32>
    %198 = vector.extract_strided_slice %0 {offsets = [2, 0], sizes = [1, 16], strides = [1, 1]} : vector<11x128xf32> to vector<1x16xf32>
    %cst_51 = arith.constant dense<0.000000e+00> : vector<8x8xf32>
    %199 = tpu.matmul %196, %195, %cst_51 {dimension_numbers = #tpu.dot_dimension_numbers<[1], [0], [0], [1], [0, 0, 1, 1], [], []>} : vector<8x8xf32>, vector<8x8xf32>, vector<8x8xf32> -> vector<8x8xf32>
    %cst_52 = arith.constant dense<0.000000e+00> : vector<8x16xf32>
    %200 = tpu.matmul %199, %197, %cst_52 {dimension_numbers = #tpu.dot_dimension_numbers<[1], [0], [0], [1], [0, 0, 1, 1], [], []>} : vector<8x8xf32>, vector<8x16xf32>, vector<8x16xf32> -> vector<8x16xf32>
    %201 = vector.broadcast %198 : vector<1x16xf32> to vector<8x16xf32>
    %202 = arith.addf %200, %201 : vector<8x16xf32>
    %cst_53 = arith.constant 0.000000e+00 : f32
    %203 = vector.broadcast %cst_53 : f32 to vector<8x16xf32>
    %204 = arith.maximumf %202, %203 : vector<8x16xf32>
    %c24 = arith.constant 24 : index
    %c0_54 = arith.constant 0 : index
    %205 = vector.load %arg5[%c24, %c0_54] : memref<192x128xf32, #tpu.memory_space<vmem>>, vector<16x16xf32>
    %206 = vector.extract_strided_slice %0 {offsets = [3, 0], sizes = [1, 16], strides = [1, 1]} : vector<11x128xf32> to vector<1x16xf32>
    %cst_55 = arith.constant dense<0.000000e+00> : vector<8x16xf32>
    %207 = tpu.matmul %196, %204, %cst_55 {dimension_numbers = #tpu.dot_dimension_numbers<[1], [0], [0], [1], [0, 0, 1, 1], [], []>} : vector<8x8xf32>, vector<8x16xf32>, vector<8x16xf32> -> vector<8x16xf32>
    %cst_56 = arith.constant dense<0.000000e+00> : vector<8x16xf32>
    %208 = tpu.matmul %207, %205, %cst_56 {dimension_numbers = #tpu.dot_dimension_numbers<[1], [0], [0], [1], [0, 0, 1, 1], [], []>} : vector<8x16xf32>, vector<16x16xf32>, vector<8x16xf32> -> vector<8x16xf32>
    %209 = vector.broadcast %206 : vector<1x16xf32> to vector<8x16xf32>
    %210 = arith.addf %208, %209 : vector<8x16xf32>
    %cst_57 = arith.constant 0.000000e+00 : f32
    %211 = vector.broadcast %cst_57 : f32 to vector<8x16xf32>
    %212 = arith.maximumf %210, %211 : vector<8x16xf32>
    %c8_58 = arith.constant 8 : index
    %c0_59 = arith.constant 0 : index
    %213 = vector.load %arg3[%c8_58, %c0_59] : memref<16x16xf32, #tpu.memory_space<vmem>>, vector<4x8xf32>
    %214 = vector.extract_strided_slice %213 {offsets = [0, 0], sizes = [4, 1], strides = [1, 1]} : vector<4x8xf32> to vector<4x1xf32>
    %cst_60 = arith.constant 5.000000e-01 : f32
    %215 = vector.broadcast %cst_60 : f32 to vector<4x1xf32>
    %216 = arith.cmpf ogt, %214, %215 : vector<4x1xf32>
    %217 = vector.extract_strided_slice %212 {offsets = [0, 0], sizes = [1, 16], strides = [1, 1]} : vector<8x16xf32> to vector<1x16xf32>
    %cst_61 = arith.constant -3.000000e+38 : f32
    %218 = vector.shape_cast %216 : vector<4x1xi1> to vector<4x1xi1>
    %219 = vector.broadcast %218 : vector<4x1xi1> to vector<4x16xi1>
    %220 = vector.shape_cast %217 : vector<1x16xf32> to vector<1x16xf32>
    %221 = vector.broadcast %220 : vector<1x16xf32> to vector<4x16xf32>
    %222 = vector.broadcast %cst_61 : f32 to vector<4x16xf32>
    %223 = arith.select %219, %221, %222 : vector<4x16xi1>, vector<4x16xf32>
    %224 = vector.extract_strided_slice %213 {offsets = [0, 1], sizes = [4, 1], strides = [1, 1]} : vector<4x8xf32> to vector<4x1xf32>
    %cst_62 = arith.constant 5.000000e-01 : f32
    %225 = vector.broadcast %cst_62 : f32 to vector<4x1xf32>
    %226 = arith.cmpf ogt, %224, %225 : vector<4x1xf32>
    %227 = vector.extract_strided_slice %212 {offsets = [1, 0], sizes = [1, 16], strides = [1, 1]} : vector<8x16xf32> to vector<1x16xf32>
    %cst_63 = arith.constant -3.000000e+38 : f32
    %228 = vector.shape_cast %226 : vector<4x1xi1> to vector<4x1xi1>
    %229 = vector.broadcast %228 : vector<4x1xi1> to vector<4x16xi1>
    %230 = vector.shape_cast %227 : vector<1x16xf32> to vector<1x16xf32>
    %231 = vector.broadcast %230 : vector<1x16xf32> to vector<4x16xf32>
    %232 = vector.broadcast %cst_63 : f32 to vector<4x16xf32>
    %233 = arith.select %229, %231, %232 : vector<4x16xi1>, vector<4x16xf32>
    %234 = vector.extract_strided_slice %213 {offsets = [0, 2], sizes = [4, 1], strides = [1, 1]} : vector<4x8xf32> to vector<4x1xf32>
    %cst_64 = arith.constant 5.000000e-01 : f32
    %235 = vector.broadcast %cst_64 : f32 to vector<4x1xf32>
    %236 = arith.cmpf ogt, %234, %235 : vector<4x1xf32>
    %237 = vector.extract_strided_slice %212 {offsets = [2, 0], sizes = [1, 16], strides = [1, 1]} : vector<8x16xf32> to vector<1x16xf32>
    %cst_65 = arith.constant -3.000000e+38 : f32
    %238 = vector.shape_cast %236 : vector<4x1xi1> to vector<4x1xi1>
    %239 = vector.broadcast %238 : vector<4x1xi1> to vector<4x16xi1>
    %240 = vector.shape_cast %237 : vector<1x16xf32> to vector<1x16xf32>
    %241 = vector.broadcast %240 : vector<1x16xf32> to vector<4x16xf32>
    %242 = vector.broadcast %cst_65 : f32 to vector<4x16xf32>
    %243 = arith.select %239, %241, %242 : vector<4x16xi1>, vector<4x16xf32>
    %244 = vector.extract_strided_slice %213 {offsets = [0, 3], sizes = [4, 1], strides = [1, 1]} : vector<4x8xf32> to vector<4x1xf32>
    %cst_66 = arith.constant 5.000000e-01 : f32
    %245 = vector.broadcast %cst_66 : f32 to vector<4x1xf32>
    %246 = arith.cmpf ogt, %244, %245 : vector<4x1xf32>
    %247 = vector.extract_strided_slice %212 {offsets = [3, 0], sizes = [1, 16], strides = [1, 1]} : vector<8x16xf32> to vector<1x16xf32>
    %cst_67 = arith.constant -3.000000e+38 : f32
    %248 = vector.shape_cast %246 : vector<4x1xi1> to vector<4x1xi1>
    %249 = vector.broadcast %248 : vector<4x1xi1> to vector<4x16xi1>
    %250 = vector.shape_cast %247 : vector<1x16xf32> to vector<1x16xf32>
    %251 = vector.broadcast %250 : vector<1x16xf32> to vector<4x16xf32>
    %252 = vector.broadcast %cst_67 : f32 to vector<4x16xf32>
    %253 = arith.select %249, %251, %252 : vector<4x16xi1>, vector<4x16xf32>
    %254 = vector.extract_strided_slice %213 {offsets = [0, 4], sizes = [4, 1], strides = [1, 1]} : vector<4x8xf32> to vector<4x1xf32>
    %cst_68 = arith.constant 5.000000e-01 : f32
    %255 = vector.broadcast %cst_68 : f32 to vector<4x1xf32>
    %256 = arith.cmpf ogt, %254, %255 : vector<4x1xf32>
    %257 = vector.extract_strided_slice %212 {offsets = [4, 0], sizes = [1, 16], strides = [1, 1]} : vector<8x16xf32> to vector<1x16xf32>
    %cst_69 = arith.constant -3.000000e+38 : f32
    %258 = vector.shape_cast %256 : vector<4x1xi1> to vector<4x1xi1>
    %259 = vector.broadcast %258 : vector<4x1xi1> to vector<4x16xi1>
    %260 = vector.shape_cast %257 : vector<1x16xf32> to vector<1x16xf32>
    %261 = vector.broadcast %260 : vector<1x16xf32> to vector<4x16xf32>
    %262 = vector.broadcast %cst_69 : f32 to vector<4x16xf32>
    %263 = arith.select %259, %261, %262 : vector<4x16xi1>, vector<4x16xf32>
    %264 = vector.extract_strided_slice %213 {offsets = [0, 5], sizes = [4, 1], strides = [1, 1]} : vector<4x8xf32> to vector<4x1xf32>
    %cst_70 = arith.constant 5.000000e-01 : f32
    %265 = vector.broadcast %cst_70 : f32 to vector<4x1xf32>
    %266 = arith.cmpf ogt, %264, %265 : vector<4x1xf32>
    %267 = vector.extract_strided_slice %212 {offsets = [5, 0], sizes = [1, 16], strides = [1, 1]} : vector<8x16xf32> to vector<1x16xf32>
    %cst_71 = arith.constant -3.000000e+38 : f32
    %268 = vector.shape_cast %266 : vector<4x1xi1> to vector<4x1xi1>
    %269 = vector.broadcast %268 : vector<4x1xi1> to vector<4x16xi1>
    %270 = vector.shape_cast %267 : vector<1x16xf32> to vector<1x16xf32>
    %271 = vector.broadcast %270 : vector<1x16xf32> to vector<4x16xf32>
    %272 = vector.broadcast %cst_71 : f32 to vector<4x16xf32>
    %273 = arith.select %269, %271, %272 : vector<4x16xi1>, vector<4x16xf32>
    %274 = vector.extract_strided_slice %213 {offsets = [0, 6], sizes = [4, 1], strides = [1, 1]} : vector<4x8xf32> to vector<4x1xf32>
    %cst_72 = arith.constant 5.000000e-01 : f32
    %275 = vector.broadcast %cst_72 : f32 to vector<4x1xf32>
    %276 = arith.cmpf ogt, %274, %275 : vector<4x1xf32>
    %277 = vector.extract_strided_slice %212 {offsets = [6, 0], sizes = [1, 16], strides = [1, 1]} : vector<8x16xf32> to vector<1x16xf32>
    %cst_73 = arith.constant -3.000000e+38 : f32
    %278 = vector.shape_cast %276 : vector<4x1xi1> to vector<4x1xi1>
    %279 = vector.broadcast %278 : vector<4x1xi1> to vector<4x16xi1>
    %280 = vector.shape_cast %277 : vector<1x16xf32> to vector<1x16xf32>
    %281 = vector.broadcast %280 : vector<1x16xf32> to vector<4x16xf32>
    %282 = vector.broadcast %cst_73 : f32 to vector<4x16xf32>
    %283 = arith.select %279, %281, %282 : vector<4x16xi1>, vector<4x16xf32>
    %284 = vector.extract_strided_slice %213 {offsets = [0, 7], sizes = [4, 1], strides = [1, 1]} : vector<4x8xf32> to vector<4x1xf32>
    %cst_74 = arith.constant 5.000000e-01 : f32
    %285 = vector.broadcast %cst_74 : f32 to vector<4x1xf32>
    %286 = arith.cmpf ogt, %284, %285 : vector<4x1xf32>
    %287 = vector.extract_strided_slice %212 {offsets = [7, 0], sizes = [1, 16], strides = [1, 1]} : vector<8x16xf32> to vector<1x16xf32>
    %cst_75 = arith.constant -3.000000e+38 : f32
    %288 = vector.shape_cast %286 : vector<4x1xi1> to vector<4x1xi1>
    %289 = vector.broadcast %288 : vector<4x1xi1> to vector<4x16xi1>
    %290 = vector.shape_cast %287 : vector<1x16xf32> to vector<1x16xf32>
    %291 = vector.broadcast %290 : vector<1x16xf32> to vector<4x16xf32>
    %292 = vector.broadcast %cst_75 : f32 to vector<4x16xf32>
    %293 = arith.select %289, %291, %292 : vector<4x16xi1>, vector<4x16xf32>
    %294 = arith.maximumf %223, %233 : vector<4x16xf32>
    %295 = arith.maximumf %243, %253 : vector<4x16xf32>
    %296 = arith.maximumf %263, %273 : vector<4x16xf32>
    %297 = arith.maximumf %283, %293 : vector<4x16xf32>
    %298 = arith.maximumf %294, %295 : vector<4x16xf32>
    %299 = arith.maximumf %296, %297 : vector<4x16xf32>
    %300 = arith.maximumf %298, %299 : vector<4x16xf32>
    %c24_76 = arith.constant 24 : index
    %c0_77 = arith.constant 0 : index
    %301 = vector.load %arg2[%c24_76, %c0_77] : memref<32x16xf32, #tpu.memory_space<vmem>>, vector<4x4xf32>
    %c40 = arith.constant 40 : index
    %c0_78 = arith.constant 0 : index
    %302 = vector.load %arg5[%c40, %c0_78] : memref<192x128xf32, #tpu.memory_space<vmem>>, vector<16x32xf32>
    %303 = vector.extract_strided_slice %0 {offsets = [4, 0], sizes = [1, 32], strides = [1, 1]} : vector<11x128xf32> to vector<1x32xf32>
    %cst_79 = arith.constant dense<0.000000e+00> : vector<4x16xf32>
    %304 = tpu.matmul %301, %300, %cst_79 {dimension_numbers = #tpu.dot_dimension_numbers<[1], [0], [0], [1], [0, 0, 1, 1], [], []>} : vector<4x4xf32>, vector<4x16xf32>, vector<4x16xf32> -> vector<4x16xf32>
    %cst_80 = arith.constant dense<0.000000e+00> : vector<4x32xf32>
    %305 = tpu.matmul %304, %302, %cst_80 {dimension_numbers = #tpu.dot_dimension_numbers<[1], [0], [0], [1], [0, 0, 1, 1], [], []>} : vector<4x16xf32>, vector<16x32xf32>, vector<4x32xf32> -> vector<4x32xf32>
    %306 = vector.broadcast %303 : vector<1x32xf32> to vector<4x32xf32>
    %307 = arith.addf %305, %306 : vector<4x32xf32>
    %cst_81 = arith.constant 0.000000e+00 : f32
    %308 = vector.broadcast %cst_81 : f32 to vector<4x32xf32>
    %309 = arith.maximumf %307, %308 : vector<4x32xf32>
    %c56 = arith.constant 56 : index
    %c0_82 = arith.constant 0 : index
    %310 = vector.load %arg5[%c56, %c0_82] : memref<192x128xf32, #tpu.memory_space<vmem>>, vector<32x32xf32>
    %311 = vector.extract_strided_slice %0 {offsets = [5, 0], sizes = [1, 32], strides = [1, 1]} : vector<11x128xf32> to vector<1x32xf32>
    %cst_83 = arith.constant dense<0.000000e+00> : vector<4x32xf32>
    %312 = tpu.matmul %301, %309, %cst_83 {dimension_numbers = #tpu.dot_dimension_numbers<[1], [0], [0], [1], [0, 0, 1, 1], [], []>} : vector<4x4xf32>, vector<4x32xf32>, vector<4x32xf32> -> vector<4x32xf32>
    %cst_84 = arith.constant dense<0.000000e+00> : vector<4x32xf32>
    %313 = tpu.matmul %312, %310, %cst_84 {dimension_numbers = #tpu.dot_dimension_numbers<[1], [0], [0], [1], [0, 0, 1, 1], [], []>} : vector<4x32xf32>, vector<32x32xf32>, vector<4x32xf32> -> vector<4x32xf32>
    %314 = vector.broadcast %311 : vector<1x32xf32> to vector<4x32xf32>
    %315 = arith.addf %313, %314 : vector<4x32xf32>
    %cst_85 = arith.constant 0.000000e+00 : f32
    %316 = vector.broadcast %cst_85 : f32 to vector<4x32xf32>
    %317 = arith.maximumf %315, %316 : vector<4x32xf32>
    %c16_86 = arith.constant 16 : index
    %c0_87 = arith.constant 0 : index
    %318 = vector.load %arg4[%c16_86, %c0_87] : memref<24x8xf32, #tpu.memory_space<vmem>>, vector<8x4xf32>
    %c16_88 = arith.constant 16 : index
    %c0_89 = arith.constant 0 : index
    %319 = vector.load %arg2[%c16_88, %c0_89] : memref<32x16xf32, #tpu.memory_space<vmem>>, vector<8x8xf32>
    %c88 = arith.constant 88 : index
    %c0_90 = arith.constant 0 : index
    %320 = vector.load %arg5[%c88, %c0_90] : memref<192x128xf32, #tpu.memory_space<vmem>>, vector<16x16xf32>
    %c104 = arith.constant 104 : index
    %c0_91 = arith.constant 0 : index
    %321 = vector.load %arg5[%c104, %c0_91] : memref<192x128xf32, #tpu.memory_space<vmem>>, vector<32x16xf32>
    %322 = vector.extract_strided_slice %0 {offsets = [6, 0], sizes = [1, 16], strides = [1, 1]} : vector<11x128xf32> to vector<1x16xf32>
    %cst_92 = arith.constant dense<0.000000e+00> : vector<8x16xf32>
    %323 = tpu.matmul %212, %320, %cst_92 {dimension_numbers = #tpu.dot_dimension_numbers<[1], [0], [0], [1], [0, 0, 1, 1], [], []>} : vector<8x16xf32>, vector<16x16xf32>, vector<8x16xf32> -> vector<8x16xf32>
    %cst_93 = arith.constant dense<0.000000e+00> : vector<4x16xf32>
    %324 = tpu.matmul %317, %321, %cst_93 {dimension_numbers = #tpu.dot_dimension_numbers<[1], [0], [0], [1], [0, 0, 1, 1], [], []>} : vector<4x32xf32>, vector<32x16xf32>, vector<4x16xf32> -> vector<4x16xf32>
    %cst_94 = arith.constant dense<0.000000e+00> : vector<8x16xf32>
    %325 = tpu.matmul %318, %324, %cst_94 {dimension_numbers = #tpu.dot_dimension_numbers<[1], [0], [0], [1], [0, 0, 1, 1], [], []>} : vector<8x4xf32>, vector<4x16xf32>, vector<8x16xf32> -> vector<8x16xf32>
    %326 = arith.addf %323, %325 : vector<8x16xf32>
    %cst_95 = arith.constant dense<0.000000e+00> : vector<8x16xf32>
    %327 = tpu.matmul %319, %326, %cst_95 {dimension_numbers = #tpu.dot_dimension_numbers<[1], [0], [0], [1], [0, 0, 1, 1], [], []>} : vector<8x8xf32>, vector<8x16xf32>, vector<8x16xf32> -> vector<8x16xf32>
    %328 = vector.broadcast %322 : vector<1x16xf32> to vector<8x16xf32>
    %329 = arith.addf %327, %328 : vector<8x16xf32>
    %cst_96 = arith.constant 0.000000e+00 : f32
    %330 = vector.broadcast %cst_96 : f32 to vector<8x16xf32>
    %331 = arith.maximumf %329, %330 : vector<8x16xf32>
    %c136 = arith.constant 136 : index
    %c0_97 = arith.constant 0 : index
    %332 = vector.load %arg5[%c136, %c0_97] : memref<192x128xf32, #tpu.memory_space<vmem>>, vector<16x16xf32>
    %333 = vector.extract_strided_slice %0 {offsets = [7, 0], sizes = [1, 16], strides = [1, 1]} : vector<11x128xf32> to vector<1x16xf32>
    %cst_98 = arith.constant dense<0.000000e+00> : vector<8x16xf32>
    %334 = tpu.matmul %319, %331, %cst_98 {dimension_numbers = #tpu.dot_dimension_numbers<[1], [0], [0], [1], [0, 0, 1, 1], [], []>} : vector<8x8xf32>, vector<8x16xf32>, vector<8x16xf32> -> vector<8x16xf32>
    %cst_99 = arith.constant dense<0.000000e+00> : vector<8x16xf32>
    %335 = tpu.matmul %334, %332, %cst_99 {dimension_numbers = #tpu.dot_dimension_numbers<[1], [0], [0], [1], [0, 0, 1, 1], [], []>} : vector<8x16xf32>, vector<16x16xf32>, vector<8x16xf32> -> vector<8x16xf32>
    %336 = vector.broadcast %333 : vector<1x16xf32> to vector<8x16xf32>
    %337 = arith.addf %335, %336 : vector<8x16xf32>
    %cst_100 = arith.constant 0.000000e+00 : f32
    %338 = vector.broadcast %cst_100 : f32 to vector<8x16xf32>
    %339 = arith.maximumf %337, %338 : vector<8x16xf32>
    %c0_101 = arith.constant 0 : index
    %c0_102 = arith.constant 0 : index
    %340 = vector.load %arg4[%c0_101, %c0_102] : memref<24x8xf32, #tpu.memory_space<vmem>>, vector<16x8xf32>
    %c0_103 = arith.constant 0 : index
    %c0_104 = arith.constant 0 : index
    %341 = vector.load %arg2[%c0_103, %c0_104] : memref<32x16xf32, #tpu.memory_space<vmem>>, vector<16x16xf32>
    %c152 = arith.constant 152 : index
    %c0_105 = arith.constant 0 : index
    %342 = vector.load %arg5[%c152, %c0_105] : memref<192x128xf32, #tpu.memory_space<vmem>>, vector<8x8xf32>
    %c160 = arith.constant 160 : index
    %c0_106 = arith.constant 0 : index
    %343 = vector.load %arg5[%c160, %c0_106] : memref<192x128xf32, #tpu.memory_space<vmem>>, vector<16x8xf32>
    %344 = vector.extract_strided_slice %0 {offsets = [8, 0], sizes = [1, 8], strides = [1, 1]} : vector<11x128xf32> to vector<1x8xf32>
    %cst_107 = arith.constant dense<0.000000e+00> : vector<16x8xf32>
    %345 = tpu.matmul %19, %342, %cst_107 {dimension_numbers = #tpu.dot_dimension_numbers<[1], [0], [0], [1], [0, 0, 1, 1], [], []>} : vector<16x8xf32>, vector<8x8xf32>, vector<16x8xf32> -> vector<16x8xf32>
    %cst_108 = arith.constant dense<0.000000e+00> : vector<8x8xf32>
    %346 = tpu.matmul %339, %343, %cst_108 {dimension_numbers = #tpu.dot_dimension_numbers<[1], [0], [0], [1], [0, 0, 1, 1], [], []>} : vector<8x16xf32>, vector<16x8xf32>, vector<8x8xf32> -> vector<8x8xf32>
    %cst_109 = arith.constant dense<0.000000e+00> : vector<16x8xf32>
    %347 = tpu.matmul %340, %346, %cst_109 {dimension_numbers = #tpu.dot_dimension_numbers<[1], [0], [0], [1], [0, 0, 1, 1], [], []>} : vector<16x8xf32>, vector<8x8xf32>, vector<16x8xf32> -> vector<16x8xf32>
    %348 = arith.addf %345, %347 : vector<16x8xf32>
    %cst_110 = arith.constant dense<0.000000e+00> : vector<16x8xf32>
    %349 = tpu.matmul %341, %348, %cst_110 {dimension_numbers = #tpu.dot_dimension_numbers<[1], [0], [0], [1], [0, 0, 1, 1], [], []>} : vector<16x16xf32>, vector<16x8xf32>, vector<16x8xf32> -> vector<16x8xf32>
    %350 = vector.broadcast %344 : vector<1x8xf32> to vector<16x8xf32>
    %351 = arith.addf %349, %350 : vector<16x8xf32>
    %cst_111 = arith.constant 0.000000e+00 : f32
    %352 = vector.broadcast %cst_111 : f32 to vector<16x8xf32>
    %353 = arith.maximumf %351, %352 : vector<16x8xf32>
    %c176 = arith.constant 176 : index
    %c0_112 = arith.constant 0 : index
    %354 = vector.load %arg5[%c176, %c0_112] : memref<192x128xf32, #tpu.memory_space<vmem>>, vector<8x8xf32>
    %355 = vector.extract_strided_slice %0 {offsets = [9, 0], sizes = [1, 8], strides = [1, 1]} : vector<11x128xf32> to vector<1x8xf32>
    %cst_113 = arith.constant dense<0.000000e+00> : vector<16x8xf32>
    %356 = tpu.matmul %341, %353, %cst_113 {dimension_numbers = #tpu.dot_dimension_numbers<[1], [0], [0], [1], [0, 0, 1, 1], [], []>} : vector<16x16xf32>, vector<16x8xf32>, vector<16x8xf32> -> vector<16x8xf32>
    %cst_114 = arith.constant dense<0.000000e+00> : vector<16x8xf32>
    %357 = tpu.matmul %356, %354, %cst_114 {dimension_numbers = #tpu.dot_dimension_numbers<[1], [0], [0], [1], [0, 0, 1, 1], [], []>} : vector<16x8xf32>, vector<8x8xf32>, vector<16x8xf32> -> vector<16x8xf32>
    %358 = vector.broadcast %355 : vector<1x8xf32> to vector<16x8xf32>
    %359 = arith.addf %357, %358 : vector<16x8xf32>
    %cst_115 = arith.constant 0.000000e+00 : f32
    %360 = vector.broadcast %cst_115 : f32 to vector<16x8xf32>
    %361 = arith.maximumf %359, %360 : vector<16x8xf32>
    %c184 = arith.constant 184 : index
    %c0_116 = arith.constant 0 : index
    %362 = vector.load %arg5[%c184, %c0_116] : memref<192x128xf32, #tpu.memory_space<vmem>>, vector<8x128xf32>
    %363 = vector.extract_strided_slice %0 {offsets = [10, 0], sizes = [1, 128], strides = [1, 1]} : vector<11x128xf32> to vector<1x128xf32>
    %cst_117 = arith.constant dense<0.000000e+00> : vector<16x128xf32>
    %364 = tpu.matmul %361, %362, %cst_117 {dimension_numbers = #tpu.dot_dimension_numbers<[1], [0], [0], [1], [0, 0, 1, 1], [], []>} : vector<16x8xf32>, vector<8x128xf32>, vector<16x128xf32> -> vector<16x128xf32>
    %365 = vector.broadcast %363 : vector<1x128xf32> to vector<16x128xf32>
    %366 = arith.addf %364, %365 : vector<16x128xf32>
    %c0_118 = arith.constant 0 : index
    %c0_119 = arith.constant 0 : index
    %c0_120 = arith.constant 0 : index
    %367 = vector.load %arg7[%c0_118, %c0_119, %c0_120] : memref<1x16x128xf32, #tpu.memory_space<vmem>>, vector<1x16x128xf32>
    %368 = vector.shape_cast %367 : vector<1x16x128xf32> to vector<16x128xf32>
    %369 = vector.shape_cast %366 : vector<16x128xf32> to vector<1x16x128xf32>
    tpu.vector_store %arg7[%c0_118, %c0_119, %c0_120], %369 {strides = array<i32>} : memref<1x16x128xf32, #tpu.memory_space<vmem>>, vector<1x16x128xf32>,
    return
  }
  func.func @transform_0(%arg0: i32) -> (i32, i32, i32) {
    %c0_i32 = arith.constant 0 : i32
    %c0_i32_0 = arith.constant 0 : i32
    %c0_i32_1 = arith.constant 0 : i32
    return %arg0, %c0_i32, %c0_i32_0 : i32, i32, i32
  }
  func.func @transform_1(%arg0: i32) -> (i32, i32) {
    %c0_i32 = arith.constant 0 : i32
    %c0_i32_0 = arith.constant 0 : i32
    %c0_i32_1 = arith.constant 0 : i32
    return %c0_i32, %c0_i32_0 : i32, i32
  }
  func.func @transform_2(%arg0: i32) -> (i32, i32) {
    %c0_i32 = arith.constant 0 : i32
    %c0_i32_0 = arith.constant 0 : i32
    %c0_i32_1 = arith.constant 0 : i32
    return %c0_i32, %c0_i32_0 : i32, i32
  }
  func.func @transform_3(%arg0: i32) -> (i32, i32) {
    %c0_i32 = arith.constant 0 : i32
    %c0_i32_0 = arith.constant 0 : i32
    %c0_i32_1 = arith.constant 0 : i32
    return %c0_i32, %c0_i32_0 : i32, i32
  }
  func.func @transform_4(%arg0: i32) -> (i32, i32) {
    %c0_i32 = arith.constant 0 : i32
    %c0_i32_0 = arith.constant 0 : i32
    %c0_i32_1 = arith.constant 0 : i32
    return %c0_i32, %c0_i32_0 : i32, i32
  }
  func.func @transform_5(%arg0: i32) -> (i32, i32) {
    %c0_i32 = arith.constant 0 : i32
    %c0_i32_0 = arith.constant 0 : i32
    %c0_i32_1 = arith.constant 0 : i32
    return %c0_i32, %c0_i32_0 : i32, i32
  }
  func.func @transform_6(%arg0: i32) -> (i32, i32, i32) {
    %c0_i32 = arith.constant 0 : i32
    %c0_i32_0 = arith.constant 0 : i32
    %c0_i32_1 = arith.constant 0 : i32
    return %arg0, %c0_i32, %c0_i32_0 : i32, i32, i32
  }
}

</mosaic_0001>

<bundles_post_ra>
// kernel: tpu_custom_call.1
= control target key start
LH: loop header
LB: loop body
LE: loop exit
PB: predicated region body
PF: predicated region fallthrough
CT: control target
= control target key end

     0   :  { %11 = vsyncpa [#allocation3], 0  ;;  %s3618_s0 = inlined_call_operand.vmem [shape: f32[2,16,4], index: 0, kind: input, shape index: {}]   ;;  %s3619_s1 = inlined_call_operand.vmem [shape: f32[32,16], index: 1, kind: input, shape index: {}]   ;;  %s3620_s2 = inlined_call_operand.vmem [shape: f32[16,16], index: 2, kind: input, shape index: {}]   ;;  %s3621_s3 = inlined_call_operand.vmem [shape: f32[24,8], index: 3, kind: input, shape index: {}]   ;;  %s3622_s4 = inlined_call_operand.hbm [shape: f32[192,128], index: 4, kind: input, shape index: {}]   ;;  %s3623_s5 = inlined_call_operand.vmem [shape: f32[11,128], index: 5, kind: input, shape index: {}]   ;;  %s3624_s6 = inlined_call_operand.hbm [shape: f32[2,16,128], index: 6, kind: output, shape index: {}]  }
   0x1   :  { %12 = vsyncpa [#allocation4], 0 }
   0x2   :  { %14 = vsyncpa [#allocation4 + $0x1], 0  ;;  %s3169_s21 = smov 0   ;;  %s3171_s22 = smov 0  }
   0x3   :  { %s3173_s23 = smov 0   ;;  %s3175_s24 = smov 0  }
   0x4 LB: > { %s3190_s25 = sadd.s32 4294967295, %s3107_s24   ;;  %s2584_s26 = sadd.s32 4294967294, %s3107_s24   ;;  %s3107_s24 = sphi %s3175_s24, %s3674_s24   ;;  %s3103_s23 = sphi %s3173_s23, %s3673_s23   ;;  %s3099_s22 = sphi %s3171_s22, %s3672_s22   ;;  %s3095_s21 = sphi %s3169_s21, %s3671_s21  }
   0x5   : > { %s3194_s27 = sadd.s32 1, %s3107_s24   ;;  %s158_s28 = sadd.s32 1, %s3103_s23 }
   0x6   : > { %s155_s29 = ssub.s32 %s3107_s24, %s3194_s27  ;;  %p168_p0 = scmp.ne.s32.totalorder %s3103_s23, %s3099_s22 }
   0x7   : > { %p156_p1 = scmp.eq.s32.totalorder %s155_s29, 0  ;;  %p169_p2 = scmp.eq.s32.totalorder %s3190_s25, 1 }
   0x8   : > { %p174_p3 = scmp.ne.s32.totalorder %s3099_s22, %s3095_s21  ;;  %p175_p4 = scmp.eq.s32.totalorder %s2584_s26, 1 }
   0x9   : > { %s3205_s30 = scalar_select %p156_p1, %s3103_s23, %s158_s28  }
   0xa   : > { %p3207_p5 = por %p169_p2, %p168_p0  ;;  %p3211_p6 = por %p175_p4, %p174_p3 }
   0xb   : > { %p2585_p7 = scmp.ge.s32.totalorder %s3107_s24, 1  ;;  %p182_p8 = scmp.lt.s32.totalorder %s3107_s24, 3 }
   0xc   : > { %s3634_s7 = scalar_select %p3207_p5, 1, 0 }
   0xd   : > { %s3635_s8 = scalar_select %p3211_p6, 1, 0 }
   0xe   : > { %p3625_p9 = scmp.eq.s32.totalorder %s3190_s25, 0  ;;  %p3218_p10 = pnand %p2585_p7, %p182_p8 }
   0xf   : > { %s3109_s10 = smov [#allocation2]   ;;  %s3013_s15 = scalar_lea.hbm %s3622_s4, 3072 }
  0x10   : > { %s3636_s9 = scalar_select %p3218_p10, 1, 0 }
  0x11   : > { %s203_s11 = sshll.u32 %s3109_s10, 4  ;;  %p2922_p11 = pneg %p3218_p10  ;;  %s204_s11 = int_to_ptr.vmem [resolvable:$true] %s203_s11 }
  0x12   : > { %p3014_p13 = scmp.ne.s32.totalorder %s3622_s4, %s3013_s15  ;;  %p3020_p3 = scmp.lt.u32.totalorder %s3013_s15, %s3622_s4 }
  0x13   : > { %p3226_p12 = pnand %p3625_p9, %p2922_p11 }
  0x15   : > { %p3015_p0 = pneg %p3226_p12 }
  0x17   : > { %p3016_p1 = pnand %p3015_p0, %p3014_p13 }
  0x19   : > { %p3017_p2 = pneg %p3016_p1 }
  0x1b   : > { %p3022_p4 = pnand %p3020_p3, %p3017_p2 }
  0x1d   : > { %3025 = shalt.err (!%p3022_p4)
}
  0x1e   : > { %s3026_s20 = scalar_lea.vmem %s204_s11, 3072  ;;  %p3034_p9 = scmp.lt.s32.totalorder %s204_s11, %s204_s11 }
  0x1f   : > { %p3027_p7 = scmp.ne.s32.totalorder %s204_s11, %s3026_s20  ;;  %p3035_p6 = scmp.lt.s32.totalorder %s3026_s20, %s3026_s20 }
  0x21   : > { %p3029_p8 = pnand %p3027_p7, %p3015_p0  ;;  %p3036_p5 = por %p3035_p6, %p3034_p9 }
  0x23   : > { %p3030_p11 = pneg %p3029_p8 }
  0x25   : > { %p3037_p10 = pnand %p3036_p5, %p3030_p11 }
  0x27   : > { %3040 = shalt.err (!%p3037_p10)
}
  0x28   : > { %s3110_s26 = smov 128   ;;  %s3111_s28 = smov 8  }
  0x29   : > { %2925 = dma.hbm_to_vmem [thread:$0]  (!%p3226_p12), %s3622_s4, 3072, %s204_s11, [#allocation3], %s3110_s26, %s3110_s26, %s3111_s28  }
  0x2a   : > { %p3638_p13 = scmp.ne.s32.totalorder %s3636_s9, 0 }
  0x2b   : > { %p3639_p1 = scmp.eq.s32.totalorder (!%p3638_p13), %s3190_s25, 0 }
  0x2c   : > { %230 = sbr.rel (%p3638_p13) target bundleno = 5082 (0x13da), region = 44 }
  0x33   : > { %3086 = dma.done.wait (%p3639_p1), [#allocation3], 3072   ;;  %p3640_p0 = pmov %p3639_p1 }
  0x34   : > { %p260_p5 = scmp.lt.s32.totalorder %s3190_s25, 1  ;;  %vm3630_vm0 = vcmask 130048   ;;  %v3260_v2 = vld [vmem:[%s3619_s1] sm:$0xff]  ;;  %v3267_v4 = vld [vmem:[%s3619_s1 + $0x8] sm:$0xff]  ;;  %vm3629_vm1 = vcmask 1043456   ;;  %vm3628_vm2 = vcmask 31744   ;;  %v354_v8 = vlaneseq }
  0x35   : > { %3088 = vsyncadd (%p3640_p0), [#allocation3], 4294964224  ;;  %2718 = vmatprep.mubr.msk.f32.mxu0 %vm3630_vm0, %v3260_v2  ;;  %v271_v5 = vld [vmem:[#allocation2] sm:$0xf]  ;;  %v446_v20 = vld [vmem:[#allocation2 + $0x8] sm:$0xff]  ;;  %v3112_v22 = vmov 2  }
  0x36   : > { %s261_s13 = scalar_select %p260_p5, %s3190_s25, 1  ;;  %2721 = vmatprep.subr.msk.mxu1 %vm3629_vm1, %v271_v5  ;;  %v3277_v9 = vshrl.u32 %v354_v8, 7  ;;  %v3285_v11 = vld [vmem:[%s3623_s5] sm:$0xff]  ;;  %2991 = vset.pattern.permute.xlu1 %v3112_v22  ;;  %v3113_v23 = vmov 0   ;;  %v3114_v25 = vmov 3   ;;  %v3115_v26 = vmov 1  }
  0x37   : > { %2722 = vmatpush3.msk.msra.mxu1 %vm3629_vm1, %v271_v5  ;;  %v610_v21 = vld [vmem:[%s3620_s2] sm:$0xff]  ;;  %2989 = vset.pattern.permute.xlu0 %v3113_v23  ;;  %v3116_v27 = vmov 4   ;;  %v3117_v28 = vmov 5   ;;  %v3118_v29 = vmov 6   ;;  %v3119_v30 = vmov 8   ;;  %s257_s28 = sand.u32 1, %s3099_s22  }
  0x38   : > { %s2637_s14 = sshll.u32 %s261_s13, 4  ;;  %v3280_v10 = vsub.s32 0, %v3277_v9  ;;  %vm611_vm3 = vcmp.gt.f32.partialorder %v610_v21, 0.5  ;;  %v3120_v31 = vmov 7   ;;  %v3121_v32 = vmov 11   ;;  %s2590_s29 = sshll.u32 %s257_s28, 4 }
  0x39   : > { %s264_s16 = scalar_lea.vmem %s3618_s0, %s2637_s14  ;;  %v612_v24 = vsel %vm611_vm3, 1, %v3113_v23  ;;  %v3122_v33 = vmov 9   ;;  %v3123_v34 = vmov 14   ;;  %v3124_v35 = vmov 10   ;;  %s259_s10 = scalar_lea.vmem [#allocation5], %s2590_s29 }
  0x3a   : > { %v267_v0 = vld [vmem:[%s264_s16] sm:$0xff]  ;;  %v268_v1 = vld [vmem:[%s264_s16 + $0x8] sm:$0xff]  ;;  %v357_v12 = vrot.slane %v3285_v11, %v3280_v10  ;;  %632 = vperm.xlu1 %2991, %v612_v24   ;;  %614 = vperm.xlu0 %2989, %v612_v24   ;;  %v3125_v36 = vmov 12   ;;  %v3126_v37 = vmov 13   ;;  %v3127_v38 = vmov 15   ;;  %s2510_s13 = sshll.u32 %s259_s10, 4  ;;  %s3570_s13 = int_to_ptr.vmem [resolvable:$true] %s2510_s13 }
  0x3b   : > { %v2869_v3 = vpack.c.bf16 %v268_v1, %v267_v0  ;;  %vm3633_vm4 = vcmask 64512   ;;  %v3128_v41 = vmov 0.0   ;;  %vm3631_vm5 = vmmov 0   ;;  %s2638_s14 = sshll.u32 %s3190_s25, 8  ;;  %s3577_s9 = scalar_lea.sflag [#allocation4], %s257_s28 }
  0x3c   : > { %v3328_v54 = vsub.s32 1, %v3277_v9  ;;  %v3333_v61 = vsub.s32 4, %v3277_v9  ;;  %v3336_v62 = vsub.s32 5, %v3277_v9  ;;  %v3339_v63 = vsub.s32 2, %v3277_v9  ;;  %s3575_s16 = scalar_lea.hbm %s3624_s6, %s2638_s14  ;;  %s3041_s11 = scalar_lea.vmem %s3570_s13, 256 }
  0x3d   : > { %2870 = vmatprep.subr.bf16.mxu0 %v2869_v3  ;;  %p3042_p6 = scmp.ne.s32.totalorder %s3570_s13, %s3041_s11  ;;  %p3669_p9 = scmp.ne.s32.totalorder %s3634_s7, 0 }
  0x3e   : > { %2872 = vmatpush3.bf16.msra.mxu0 %v2869_v3  ;;  %2992 = vset.pattern.permute.xlu1 %v3114_v25  ;;  %v525_v57 = vrot.slane %v3285_v11, %v3328_v54  ;;  %v3343_v3 = vsub.s32 3, %v3277_v9  ;;  %s3131_s25 = smov [#allocation5]  }
  0x3f   : > { %2733 = vmatprep.subr.mxu0 %v446_v20  ;;  %2990 = vset.pattern.permute.xlu0 %v3115_v26  ;;  %p3043_p10 = pnand %p3042_p6, %p3669_p9  ;;  %s3045_s17 = sshll.u32 %s3131_s25, 4  ;;  %s3046_s17 = int_to_ptr.vmem [resolvable:$false] %s3045_s17 }
  0x40   : > { %641 = vperm.xlu1 %2992, %v612_v24   ;;  %623 = vperm.xlu0 %2990, %v612_v24   ;;  %s3047_s18 = scalar_lea.vmem %s3046_s17, 512  ;;  %p3048_p2 = scmp.lt.s32.totalorder %s3570_s13, %s3046_s17 }
  0x41   : > { %2719 = vmatmul.mubr.msk.f32.vlgmr.msra.gmra.mrb[0].mxu0 %vm3630_vm0, %v3267_v4  ;;  %p3044_p12 = pneg %p3043_p10  ;;  %p3049_p3 = scmp.lt.s32.totalorder %s3047_s18, %s3041_s11 }
  0x42   : > { %2734 = vmatpush3.msra.mxu0 %v446_v20 }
  0x43   : > { %2743 = vmatprep.subr.mxu0 %v3128_v41  ;;  %p3050_p4 = por %p3049_p3, %p3048_p2 }
  0x44   : > { %2993 = vset.pattern.permute.xlu1 %v3116_v27  ;;  %2994 = vset.pattern.permute.xlu0 %v3117_v28 }
  0x45   : > { %650 = vperm.xlu1 %2993, %v612_v24   ;;  %659 = vperm.xlu0 %2994, %v612_v24   ;;  %p3051_p7 = pnand %p3050_p4, %p3044_p12 }
  0x49   : > { %2995 = vset.pattern.permute.xlu1 %v3118_v29  ;;  %2997 = vset.pattern.permute.xlu0 %v3119_v30 }
  0x4a   : > { %668 = vperm.xlu1 %2995, %v612_v24   ;;  %686 = vperm.xlu0 %2997, %v612_v24  }
  0x4e   : > { %2996 = vset.pattern.permute.xlu1 %v3120_v31  ;;  %3000 = vset.pattern.permute.xlu0 %v3121_v32 }
  0x4f   : > { %677 = vperm.xlu1 %2996, %v612_v24   ;;  %713 = vperm.xlu0 %3000, %v612_v24  }
  0x53   : > { %2998 = vset.pattern.permute.xlu1 %v3122_v33  ;;  %3003 = vset.pattern.permute.xlu0 %v3123_v34 }
  0x54   : > { %695 = vperm.xlu1 %2998, %v612_v24   ;;  %740 = vperm.xlu0 %3003, %v612_v24  }
  0x58   : > { %2999 = vset.pattern.permute.xlu1 %v3124_v35  ;;  %3006 = vset.pattern.permute.xlu0 %v3115_v26 }
  0x59   : > { %704 = vperm.xlu1 %2999, %v612_v24  }
  0x5d   : > { %3001 = vset.pattern.permute.xlu1 %v3125_v36 }
  0x5e   : > { %722 = vperm.xlu1 %3001, %v612_v24  }
  0x62   : > { %3002 = vset.pattern.permute.xlu1 %v3126_v37 }
  0x63   : > { %731 = vperm.xlu1 %3002, %v612_v24  }
  0x67   : > { %3004 = vset.pattern.permute.xlu1 %v3127_v38 }
  0x68   : > { %749 = vperm.xlu1 %3004, %v612_v24  }
  0x6c   : > { %3005 = vset.pattern.permute.xlu1 %v3113_v23 }
  0xb9   : > { %v3311_v42 = vpop.permute.xlu1 %632  ;;  %v3321_v47 = vpop.permute.xlu0 %614 }
  0xba   : > { %vm616_vm8 = vcmp.eq.s32.totalorder %v3321_v47, 1  ;;  %vm634_vm9 = vcmp.eq.s32.totalorder %v3311_v42, 1 }
  0xbf   : > { %v3313_v43 = vpop.permute.xlu1 %641  ;;  %v3323_v49 = vpop.permute.xlu0 %623 }
  0xc0   : > { %vm625_vm10 = vcmp.eq.s32.totalorder %v3323_v49, 1  ;;  %vm643_vm14 = vcmp.eq.s32.totalorder %v3313_v43, 1 }
  0xc4   : > { %v3315_v44 = vpop.permute.xlu1 %650  ;;  %v3325_v51 = vpop.permute.xlu0 %659 }
  0xc5   : > { %vm652_vm15 = vcmp.eq.s32.totalorder %v3315_v44, 1  ;;  %vm661_vm3 = vcmp.eq.s32.totalorder %v3325_v51, 1 }
  0xc9   : > { %v3317_v45 = vpop.permute.xlu1 %668  ;;  %v687_v53 = vpop.permute.xlu0 %686 }
  0xca   : > { %vm688_vm7 = vcmp.eq.s32.totalorder %v687_v53, 1 }
  0xce   : > { %v3319_v46 = vpop.permute.xlu1 %677  ;;  %v714_v56 = vpop.permute.xlu0 %713 }
  0xd3   : > { %v696_v48 = vpop.permute.xlu1 %695  ;;  %v741_v1 = vpop.permute.xlu0 %740 }
  0xd4   : > { %vm697_vm6 = vcmp.eq.s32.totalorder %v696_v48, 1 }
  0xd8   : > { %v705_v50 = vpop.permute.xlu1 %704 }
  0xd9   : > { %vm706_vm11 = vcmp.eq.s32.totalorder %v705_v50, 1 }
  0xdd   : > { %v723_v52 = vpop.permute.xlu1 %722 }
  0xde   : > { %vm724_vm12 = vcmp.eq.s32.totalorder %v723_v52, 1 }
  0xe2   : > { %v732_v55 = vpop.permute.xlu1 %731 }
  0xe3   : > { %vm733_vm13 = vcmp.eq.s32.totalorder %v732_v55, 1 }
  0xe7   : > { %v750_v59 = vpop.permute.xlu1 %749 }
  0xe8   : > { %vm751_vm1 = vcmp.eq.s32.totalorder %v750_v59, 1 }
 0x114   : > { %v2720_v6 = vpop.f32.mrb[0].mxu0 }
 0x115   : > { %v345_v7 = vpop.f32.mrb[1].mxu0 }
 0x116   : > { %2723 = vmatprep.mubr.msk.f32.mxu1 %vm3628_vm2, %v345_v7  ;;  %v3349_v7 = vsub.s32 6, %v3277_v9 }
 0x117   : > { %2724 = vmatmul.mubr.msk.f32.vlgmr.msra.gmra.mrb[0].mxu1 %vm3628_vm2, %v2720_v6  ;;  %v3346_v6 = vsub.s32 7, %v3277_v9  ;;  %vm715_vm2 = vcmp.eq.s32.totalorder %v714_v56, 1 }
 0x118   : > { %2730 = vmatprep.mubr.msk.f32.mxu1 %vm3630_vm0, %v3260_v2 }
 0x1ea   : > { %v2725_v13 = vpop.f32.mrb[0].mxu1 }
 0x1eb   : > { %v441_v14 = vadd.f32 %v2725_v13, %v357_v12  ;;  %v435_v15 = vpop.f32.mrb[1].mxu1 }
 0x1ec   : > { %v436_v16 = vadd.f32 %v435_v15, %v357_v12 }
 0x1ed   : > { %v445_v17 = vmax.f32 %v441_v14, 0.0 }
 0x1ee   : > { %v444_v18 = vmax.f32 %v436_v16, 0.0 }
 0x1f0   : > { %v2873_v19 = vpack.c.bf16 %v445_v17, %v444_v18 }
 0x1f2   : > { %2874 = vmatprep.subr.bf16.mxu1 %v2873_v19 }
 0x1f3   : > { %2876 = vmatpush3.bf16.msra.mxu1 %v2873_v19 }
 0x1f4   : > { %2738 = vmatprep.subr.mxu1 %v3128_v41 }
 0x1f6   : > { %2731 = vmatmul.mubr.msk.f32.vlgmr.msra.gmra.mrb[2].mxu1 %vm3630_vm0, %v3267_v4  ;;  %vm742_vm0 = vcmp.eq.s32.totalorder %v741_v1, 1 }
 0x1f7   : > { %2740 = vmatprep.mubr.msk.f32.mxu1 %vm3631_vm5, %v3128_v41 }
 0x2c9   : > { %v2732_v39 = vpop.f32.mrb[2].mxu1 }
 0x2ca   : > { %v513_v40 = vpop.f32.mrb[3].mxu1 }
 0x2cb   : > { %2735 = vmatprep.mubr.msk.f32.mxu0 %vm3633_vm4, %v513_v40 }
 0x2cc   : > { %2736 = vmatmul.mubr.msk.f32.vlgmr.msra.gmra.mrb[2].mxu0 %vm3633_vm4, %v2732_v39  ;;  %vm679_vm4 = vcmp.eq.s32.totalorder %v3319_v46, 1 }
 0x2cd   : > { %2745 = vmatprep.mubr.msk.f32.mxu0 %vm3631_vm5, %v3128_v41  ;;  %vm670_vm5 = vcmp.eq.s32.totalorder %v3317_v45, 1  ;;  %v773_v45 = vld [vmem:[#allocation2 + $0x10] sm:$0xff] }
 0x2ce   : > { %2744 = vmatpush3.msra.mxu0 %v773_v45 }
 0x39f   : > { %v2737_v58 = vpop.f32.mrb[2].mxu0 }
 0x3a0   : > { %v605_v60 = vadd.f32 %v2737_v58, %v525_v57  ;;  %v599_v0 = vpop.f32.mrb[3].mxu0 }
 0x3a1   : > { %v600_v5 = vadd.f32 %v599_v0, %v525_v57 }
 0x3a2   : > { %v3353_v8 = vmax.f32 %v605_v60, 0.0 }
 0x3a3   : > { %v3358_v12 = vmax.f32 %v600_v5, 0.0 }
 0x3a4   : > { %v728_v9 = vrot.slane %v3353_v8, %v3333_v61  ;;  %v737_v13 = vrot.slane %v3353_v8, %v3336_v62  ;;  %v692_v14 = vrot.slane %v3353_v8, %v3280_v10  ;;  %v701_v15 = vrot.slane %v3353_v8, %v3328_v54 }
 0x3a5   : > { %v710_v16 = vrot.slane %v3353_v8, %v3339_v63  ;;  %v719_v17 = vrot.slane %v3353_v8, %v3343_v3  ;;  %v755_v18 = vrot.slane %v3353_v8, %v3346_v6  ;;  %v746_v19 = vrot.slane %v3353_v8, %v3349_v7 }
 0x3a6   : > { %v729_v20 = vsel %vm724_vm12, %v728_v9, -3e+38  ;;  %v738_v21 = vsel %vm733_vm13, %v737_v13, -3e+38  ;;  %v693_v24 = vsel %vm688_vm7, %v692_v14, -3e+38  ;;  %v620_v26 = vrot.slane %v3358_v12, %v3280_v10 }
 0x3a7   : > { %v702_v30 = vsel %vm697_vm6, %v701_v15, -3e+38  ;;  %v711_v32 = vsel %vm706_vm11, %v710_v16, -3e+38  ;;  %v720_v33 = vsel %vm715_vm2, %v719_v17, -3e+38  ;;  %v763_v38 = vmax.f32 %v729_v20, %v738_v21 }
 0x3a8   : > { %v761_v34 = vmax.f32 %v693_v24, %v702_v30  ;;  %v762_v35 = vmax.f32 %v711_v32, %v720_v33  ;;  %v756_v36 = vsel %vm751_vm1, %v755_v18, -3e+38  ;;  %v747_v37 = vsel %vm742_vm0, %v746_v19, -3e+38  ;;  %v3421_v18 = vld [vmem:[%s3619_s1 + $0x10] sm:$0xff]  ;;  %v925_v20 = vld [vmem:[#allocation2 + $0x18] sm:$0xff] }
 0x3a9   : > { %v764_v39 = vmax.f32 %v747_v37, %v756_v36  ;;  %v629_v40 = vrot.slane %v3358_v12, %v3328_v54  ;;  %v638_v52 = vrot.slane %v3358_v12, %v3339_v63  ;;  %v621_v48 = vsel %vm616_vm8, %v620_v26, -3e+38  ;;  %v926_v21 = vld [vmem:[#allocation2 + $0x20] sm:$0xff]  ;;  %v1075_v36 = vld [vmem:[%s3620_s2 + $0x8] sm:$0xf] }
 0x3aa   : > { %v647_v50 = vrot.slane %v3358_v12, %v3343_v3  ;;  %v656_v53 = vrot.slane %v3358_v12, %v3333_v61  ;;  %v665_v55 = vrot.slane %v3358_v12, %v3336_v62  ;;  %v767_v56 = vmax.f32 %v761_v34, %v762_v35 }
 0x3ab   : > { %v630_v57 = vsel %vm625_vm10, %v629_v40, -3e+38  ;;  %v639_v58 = vsel %vm634_vm9, %v638_v52, -3e+38  ;;  %v674_v47 = vrot.slane %v3358_v12, %v3349_v7  ;;  %v683_v1 = vrot.slane %v3358_v12, %v3346_v6 }
 0x3ac   : > { %v648_v59 = vsel %vm643_vm14, %v647_v50, -3e+38  ;;  %v657_v60 = vsel %vm652_vm15, %v656_v53, -3e+38  ;;  %v666_v0 = vsel %vm661_vm3, %v665_v55, -3e+38  ;;  %v768_v49 = vmax.f32 %v763_v38, %v764_v39 }
 0x3ad   : > { %v675_v42 = vsel %vm670_vm5, %v674_v47, -3e+38  ;;  %v757_v5 = vmax.f32 %v621_v48, %v630_v57  ;;  %v758_v9 = vmax.f32 %v639_v58, %v648_v59  ;;  %v684_v13 = vsel %vm679_vm4, %v683_v1, -3e+38 }
 0x3ae   : > { %v759_v43 = vmax.f32 %v657_v60, %v666_v0  ;;  %v760_v14 = vmax.f32 %v675_v42, %v684_v13  ;;  %v770_v44 = vmax.f32 %v767_v56, %v768_v49  ;;  %vm3641_vm0 = vcmask 64512  }
 0x3af   : > { %v765_v15 = vmax.f32 %v757_v5, %v758_v9  ;;  %vm3642_vm1 = vmmov 0   ;;  %vm3643_vm2 = vmmov %vm3641_vm0  ;;  %v3130_v24 = vmov 0.0|0.0   ;;  %v2878_v26 = vpack.c.bf16 %v926_v21, %v925_v20 }
 0x3b0   : > { %v766_v16 = vmax.f32 %v759_v43, %v760_v14  ;;  %2877 = vmatprep.subr.bf16.mxu0 %v3130_v24  ;;  %v850_v30 = vrot.slane %v3285_v11, %v3339_v63  ;;  %vm3644_vm4 = vmmov %vm3641_vm0  ;;  %vm1076_vm5 = vcmp.gt.f32.partialorder %v1075_v36, 0.5  ;;  %vm3645_vm6 = vcmask 130048  }
 0x3b1   : > { %v1077_v37 = vsel %vm1076_vm5, 1, %v3113_v23  ;;  %v1000_v48 = vrot.slane %v3285_v11, %v3343_v3  ;;  %vm3646_vm15 = vcmask 1043456   ;;  %vm3647_vm3 = vcmask 31744  }
 0x3b2   : > { %v769_v17 = vmax.f32 %v765_v15, %v766_v16  ;;  %1079 = vperm.xlu1 %3005, %v1077_v37   ;;  %1088 = vperm.xlu0 %3006, %v1077_v37   ;;  %vm1395_vm5 = vcmask 261120  }
 0x3b4   : > { %v771_v51 = vmax.f32 %v769_v17, %v770_v44 }
 0x3b6   : > { %2739 = vmatpush3.msra.mxu1 %v771_v51  ;;  %3007 = vset.pattern.permute.xlu1 %v3112_v22  ;;  %v1158_v22 = vld [vmem:[#allocation2 + $0x28] sm:$0xff] }
 0x3b7   : > { %2741 = vmatmul.mubr.msk.f32.vlgmr.msra.gmra.mrb[4].mxu1 %vm3641_vm0, %v3421_v18  ;;  %2748 = vmatprep.subr.mxu1 %v3128_v41  ;;  %vm3648_vm0 = vmmov %vm3645_vm6 }
 0x3b8   : > { %2750 = vmatprep.mubr.msk.f32.mxu1 %vm3642_vm1, %v3128_v41  ;;  %3009 = vset.pattern.permute.xlu0 %v3116_v27  ;;  %v1159_v27 = vld [vmem:[#allocation2 + $0x30] sm:$0xff] }
 0x3b9   : > { %1097 = vperm.xlu1 %3007, %v1077_v37   ;;  %1115 = vperm.xlu0 %3009, %v1077_v37  }
 0x3bd   : > { %3008 = vset.pattern.permute.xlu1 %v3114_v25  ;;  %3012 = vset.pattern.permute.xlu0 %v3120_v31  ;;  %v2881_v25 = vpack.c.bf16 %v1159_v27, %v1158_v22 }
 0x3be   : > { %1106 = vperm.xlu1 %3008, %v1077_v37   ;;  %1142 = vperm.xlu0 %3012, %v1077_v37  }
 0x3c2   : > { %3010 = vset.pattern.permute.xlu1 %v3117_v28 }
 0x3c3   : > { %1124 = vperm.xlu1 %3010, %v1077_v37  }
 0x3c7   : > { %3011 = vset.pattern.permute.xlu1 %v3118_v29 }
 0x3c8   : > { %1133 = vperm.xlu1 %3011, %v1077_v37   ;;  %v1317_v37 = vld [vmem:[#allocation2 + $0x50] sm:$0xff] }
 0x431   : > { %v1080_v31 = vpop.permute.xlu1 %1079  ;;  %v1089_v40 = vpop.permute.xlu0 %1088 }
 0x432   : > { %vm1081_vm7 = vcmp.eq.s32.totalorder %v1080_v31, 1  ;;  %vm1090_vm9 = vcmp.eq.s32.totalorder %v1089_v40, 1 }
 0x438   : > { %v1098_v39 = vpop.permute.xlu1 %1097  ;;  %v1116_v29 = vpop.permute.xlu0 %1115 }
 0x439   : > { %vm1099_vm8 = vcmp.eq.s32.totalorder %v1098_v39, 1  ;;  %vm1117_vm10 = vcmp.eq.s32.totalorder %v1116_v29, 1  ;;  %v1473_v39 = vld [vmem:[#allocation2 + $0x68] sm:$0xff]  ;;  %v1475_v29 = vld [vmem:[#allocation2 + $0x78] sm:$0xff] }
 0x43d   : > { %v1107_v28 = vpop.permute.xlu1 %1106  ;;  %v1143_v57 = vpop.permute.xlu0 %1142 }
 0x43e   : > { %vm1108_vm11 = vcmp.eq.s32.totalorder %v1107_v28, 1  ;;  %vm1144_vm14 = vcmp.eq.s32.totalorder %v1143_v57, 1  ;;  %v1474_v28 = vld [vmem:[#allocation2 + $0x70] sm:$0xff] }
 0x43f   : > { %v2890_v40 = vpack.c.bf16 %v1474_v28, %v1473_v39 }
 0x442   : > { %v1125_v52 = vpop.permute.xlu1 %1124 }
 0x443   : > { %vm1126_vm12 = vcmp.eq.s32.totalorder %v1125_v52, 1 }
 0x447   : > { %v1134_v53 = vpop.permute.xlu1 %1133 }
 0x448   : > { %vm1135_vm13 = vcmp.eq.s32.totalorder %v1134_v53, 1  ;;  %v1394_v53 = vrot.slane %v3285_v11, %v3336_v62 }
 0x48a   : > { %v843_v46 = vpop.f32.mrb[4].mxu1 }
 0x48b   : > { %v2742_v19 = vpop.f32.mrb[5].mxu1  ;;  %2746 = vmatmul.mubr.msk.f32.vlgmr.msra.gmra.mrb[4].mxu0 %vm3643_vm2, %v843_v46  ;;  %vm3649_vm2 = vmmov %vm3646_vm15 }
 0x48c   : > { %2757 = vmatprep.mubr.msk.f32.mxu0 %vm3642_vm1, %v3128_v41  ;;  %2879 = vmatpush3.bf16.msra.mxu0 %v2878_v26  ;;  %v1157_v26 = vld [vmem:[%s3619_s1 + $0x18] sm:$0xf] }
 0x48d   : > { %2880 = vmatprep.subr.bf16.mxu0 %v3130_v24 }
 0x55e   : > { %v920_v32 = vpop.f32.mrb[4].mxu0 }
 0x55f   : > { %v921_v33 = vadd.f32 %v920_v32, %v850_v30  ;;  %v2747_v34 = vpop.f32.mrb[5].mxu0 }
 0x560   : > { %v1315_v34 = vld [vmem:[#allocation2 + $0x40] sm:$0xff] }
 0x561   : > { %v924_v35 = vmax.f32 %v921_v33, 0.0  ;;  %v1314_v33 = vld [vmem:[#allocation2 + $0x38] sm:$0xff] }
 0x562   : > { %v2884_v36 = vpack.c.bf16 %v1315_v34, %v1314_v33  ;;  %v266_v34 = vld [vmem:[%s3623_s5 + $0x8] sm:$0x7] }
 0x563   : > { %2749 = vmatpush3.msra.mxu1 %v924_v35  ;;  %v1316_v35 = vld [vmem:[#allocation2 + $0x48] sm:$0xff] }
 0x564   : > { %2751 = vmatmul.mubr.msk.f32.vlgmr.msra.gmra.mrb[6].mxu1 %vm3644_vm4, %v3421_v18  ;;  %2760 = vmatprep.subr.mxu1 %v3128_v41  ;;  %vm3650_vm4 = vmmov %vm3647_vm3 }
 0x565   : > { %2762 = vmatprep.mubr.msk.f32.mxu1 %vm3642_vm1, %v3128_v41 }
 0x637   : > { %v993_v23 = vpop.f32.mrb[6].mxu1 }
 0x638   : > { %v2752_v38 = vpop.f32.mrb[7].mxu1  ;;  %2758 = vmatmul.mubr.msk.f32.vlgmr.msra.gmra.mrb[6].mxu0 %vm3645_vm6, %v993_v23  ;;  %v2887_v23 = vpack.c.bf16 %v1317_v37, %v1316_v35  ;;  %vm3651_vm6 = vmmov %vm3649_vm2 }
 0x639   : > { %2769 = vmatprep.mubr.msk.f32.mxu0 %vm3642_vm1, %v3128_v41  ;;  %2882 = vmatpush3.bf16.msra.mxu0 %v2881_v25  ;;  %v1239_v38 = vrot.slane %v3285_v11, %v3333_v61 }
 0x63a   : > { %2883 = vmatprep.subr.bf16.mxu0 %v3130_v24 }
 0x70b   : > { %v1070_v50 = vpop.f32.mrb[6].mxu0 }
 0x70c   : > { %v1071_v55 = vadd.f32 %v1070_v50, %v1000_v48  ;;  %v2759_v56 = vpop.f32.mrb[7].mxu0  ;;  %v1476_v48 = vld [vmem:[#allocation2 + $0x80] sm:$0xff] }
 0x70d   : > { %v2893_v50 = vpack.c.bf16 %v1476_v48, %v1475_v29  ;;  %v2412_v29 = vrot.slane %v266_v34, %v3339_v63 }
 0x70e   : > { %v3456_v58 = vmax.f32 %v1071_v55, 0.0 }
 0x710   : > { %v1139_v47 = vrot.slane %v3456_v58, %v3349_v7  ;;  %v1085_v59 = vrot.slane %v3456_v58, %v3280_v10  ;;  %v1094_v60 = vrot.slane %v3456_v58, %v3328_v54  ;;  %v1103_v0 = vrot.slane %v3456_v58, %v3339_v63 }
 0x711   : > { %v1112_v1 = vrot.slane %v3456_v58, %v3343_v3  ;;  %v1121_v49 = vrot.slane %v3456_v58, %v3333_v61  ;;  %v1130_v42 = vrot.slane %v3456_v58, %v3336_v62  ;;  %v1148_v5 = vrot.slane %v3456_v58, %v3346_v6 }
 0x712   : > { %v1140_v9 = vsel %vm1135_vm13, %v1139_v47, -3e+38  ;;  %v1086_v13 = vsel %vm1081_vm7, %v1085_v59, -3e+38  ;;  %v1095_v43 = vsel %vm1090_vm9, %v1094_v60, -3e+38  ;;  %vm3652_vm7 = vmmov %vm3647_vm3 }
 0x713   : > { %v1104_v14 = vsel %vm1099_vm8, %v1103_v0, -3e+38  ;;  %v1113_v15 = vsel %vm1108_vm11, %v1112_v1, -3e+38  ;;  %v1122_v3 = vsel %vm1117_vm10, %v1121_v49, -3e+38  ;;  %v1150_v44 = vmax.f32 %v1086_v13, %v1095_v43  ;;  %vm3653_vm8 = vmmov %vm3648_vm0 }
 0x714   : > { %v1131_v16 = vsel %vm1126_vm12, %v1130_v42, -3e+38  ;;  %v1149_v17 = vsel %vm1144_vm14, %v1148_v5, -3e+38  ;;  %v1151_v51 = vmax.f32 %v1104_v14, %v1113_v15  ;;  %v1471_v59 = vld [vmem:[#allocation2 + $0x58] sm:$0xff]  ;;  %v1472_v60 = vld [vmem:[#allocation2 + $0x60] sm:$0xff]  ;;  %vm3656_vm11 = vmmov %vm3648_vm0 }
 0x715   : > { %v1152_v45 = vmax.f32 %v1122_v3, %v1131_v16  ;;  %v1153_v46 = vmax.f32 %v1140_v9, %v1149_v17  ;;  %v1470_v0 = vld [vmem:[%s3621_s3 + $0x10] sm:$0xff]  ;;  %v2896_v1 = vpack.c.bf16 %v1472_v60, %v1471_v59  ;;  %vm3654_vm9 = vcmask 64512   ;;  %v1774_v9 = vld [vmem:[#allocation2 + $0x88] sm:$0xff]  ;;  %vm3657_vm12 = vmmov %vm3648_vm0 }
 0x716   : > { %v1154_v19 = vmax.f32 %v1150_v44, %v1151_v51  ;;  %v1775_v13 = vld [vmem:[#allocation2 + $0x90] sm:$0xff]  ;;  %vm3655_vm10 = vmmov %vm3654_vm9  ;;  %v1927_v51 = vld [vmem:[#allocation2 + $0xa0] sm:$0xff] }
 0x717   : > { %v1155_v20 = vmax.f32 %v1152_v45, %v1153_v46  ;;  %v2899_v43 = vpack.c.bf16 %v1775_v13, %v1774_v9  ;;  %v1928_v45 = vld [vmem:[#allocation2 + $0xa8] sm:$0xff]  ;;  %v1849_v46 = vrot.slane %v3285_v11, %v3346_v6  ;;  %vm3658_vm13 = vmmov %vm3648_vm0  ;;  %v1926_v6 = vld [vmem:[#allocation2 + $0x98] sm:$0xff] }
 0x719   : > { %v1156_v21 = vmax.f32 %v1154_v19, %v1155_v20 }
 0x71b   : > { %2761 = vmatpush3.msk.msra.mxu1 %vm3646_vm15, %v1156_v21 }
 0x71c   : > { %2763 = vmatmul.mubr.msk.f32.vlgmr.msra.gmra.mrb[8].mxu1 %vm3647_vm3, %v1157_v26  ;;  %2772 = vmatprep.subr.mxu1 %v3128_v41 }
 0x71d   : > { %2774 = vmatprep.mubr.msk.f32.mxu1 %vm3642_vm1, %v3128_v41 }
 0x7ef   : > { %v1232_v30 = vpop.f32.mrb[8].mxu1 }
 0x7f0   : > { %v2764_v32 = vpop.f32.mrb[9].mxu1  ;;  %2770 = vmatmul.mubr.msk.f32.vlgmr.msra.gmra.mrb[8].mxu0 %vm3648_vm0, %v1232_v30 }
 0x7f1   : > { %2785 = vmatprep.mubr.msk.f32.mxu0 %vm3642_vm1, %v3128_v41  ;;  %2885 = vmatpush3.bf16.msra.mxu0 %v2884_v36 }
 0x7f2   : > { %2886 = vmatprep.subr.bf16.mxu0 %v3130_v24 }
 0x7f5   : > { %2888 = vmatpush3.bf16.msra.mxu0 %v2887_v23 }
 0x7f6   : > { %2799 = vmatprep.subr.mxu0 %v3128_v41 }
 0x8c3   : > { %v1309_v22 = vpop.f32.mrb[8].mxu0 }
 0x8c4   : > { %v1310_v27 = vadd.f32 %v1309_v22, %v1239_v38  ;;  %v2771_v25 = vpop.f32.mrb[9].mxu0 }
 0x8c6   : > { %v1313_v31 = vmax.f32 %v1310_v27, 0.0  ;;  %v2245_v27 = vld [vmem:[#allocation2 + $0xb0] sm:$0xff] }
 0x8c8   : > { %2773 = vmatpush3.msk.msra.mxu1 %vm3649_vm2, %v1313_v31  ;;  %vm3663_vm2 = vmmov %vm3648_vm0  ;;  %v2324_v31 = vrot.slane %v266_v34, %v3328_v54 }
 0x8c9   : > { %2775 = vmatmul.mubr.msk.f32.vlgmr.msra.gmra.mrb[10].mxu1 %vm3650_vm4, %v1157_v26  ;;  %2889 = vmatprep.subr.bf16.mxu1 %v3130_v24  ;;  %vm3664_vm4 = vmmov %vm3648_vm0 }
 0x8ca   : > { %2796 = vmatprep.mubr.msk.f32.mxu1 %vm3642_vm1, %v3128_v41  ;;  %2891 = vmatpush3.bf16.msra.mxu1 %v2890_v40 }
 0x8cb   : > { %2892 = vmatprep.subr.bf16.mxu1 %v3130_v24 }
 0x8ce   : > { %2894 = vmatpush3.bf16.msra.mxu1 %v2893_v50 }
 0x8cf   : > { %2811 = vmatprep.subr.mxu1 %v3128_v41 }
 0x99c   : > { %v1387_v61 = vpop.f32.mrb[10].mxu1 }
 0x99d   : > { %v2776_v52 = vpop.f32.mrb[11].mxu1  ;;  %2786 = vmatmul.mubr.msk.f32.vlgmr.msra.gmra.mrb[10].mxu0 %vm1395_vm5, %v1387_v61 }
 0x99e   : > { %2801 = vmatprep.mubr.msk.f32.mxu0 %vm3642_vm1, %v3128_v41 }
 0xa70   : > { %v1465_v55 = vpop.f32.mrb[10].mxu0 }
 0xa71   : > { %v1466_v56 = vadd.f32 %v1465_v55, %v1394_v53  ;;  %v2787_v57 = vpop.f32.mrb[11].mxu0 }
 0xa73   : > { %v1469_v47 = vmax.f32 %v1466_v56, 0.0 }
 0xa75   : > { %2797 = vmatmul.mubr.msk.f32.vlgmr.msra.gmra.mrb[12].mxu1 %vm1395_vm5, %v1469_v47 }
 0xa76   : > { %2813 = vmatprep.mubr.msk.f32.mxu1 %vm3642_vm1, %v3128_v41 }
 0xb48   : > { %v1546_v49 = vpop.f32.mrb[12].mxu1 }
 0xb49   : > { %v2798_v42 = vpop.f32.mrb[13].mxu1  ;;  %2800 = vmatpush3.msk.msra.mxu0 %vm3651_vm6, %v1546_v49 }
 0xb4a   : > { %2802 = vmatmul.mubr.msk.f32.vlgmr.msra.gmra.mrb[12].mxu0 %vm3652_vm7, %v1470_v0  ;;  %2895 = vmatprep.subr.bf16.mxu0 %v3130_v24 }
 0xb4b   : > { %2897 = vmatpush3.bf16.msra.mxu0 %v2896_v1  ;;  %2808 = vmatprep.mubr.msk.f32.mxu0 %vm3642_vm1, %v3128_v41 }
 0xb4c   : > { %2898 = vmatprep.subr.bf16.mxu0 %v3130_v24 }
 0xb52   : > { %2809 = vmatmul.mubr.msk.f32.vlgmr.msra.gmra.mrb[12].mxu0 %vm3653_vm8, %v3456_v58  ;;  %v1702_v58 = vrot.slane %v3285_v11, %v3349_v7  ;;  %v2902_v7 = vpack.c.bf16 %v1928_v45, %v1927_v51  ;;  %v1925_v11 = vld [vmem:[%s3621_s3 + $0x8] sm:$0xff] }
 0xb53   : > { %2825 = vmatprep.mubr.msk.f32.mxu0 %vm3642_vm1, %v3128_v41  ;;  %2900 = vmatpush3.bf16.msra.mxu0 %v2899_v43 }
 0xc25   : > { %v1695_v62 = vpop.f32.mrb[12].mxu0 }
 0xc26   : > { %v2810_v5 = vpop.f32.mrb[13].mxu0  ;;  %2812 = vmatpush3.msra.mxu1 %v1695_v62 }
 0xc27   : > { %2814 = vmatmul.mubr.msk.f32.vlgmr.msra.gmra.mrb[14].mxu1 %vm3654_vm9, %v3421_v18  ;;  %2816 = vmatprep.subr.mxu1 %v3128_v41 }
 0xc28   : > { %2818 = vmatprep.mubr.msk.f32.mxu1 %vm3642_vm1, %v3128_v41 }
 0xcfa   : > { %v1769_v14 = vpop.f32.mrb[14].mxu1 }
 0xcfb   : > { %v1770_v15 = vadd.f32 %v1769_v14, %v1702_v58  ;;  %v2815_v3 = vpop.f32.mrb[15].mxu1 }
 0xcfd   : > { %v1773_v44 = vmax.f32 %v1770_v15, 0.0 }
 0xcff   : > { %2817 = vmatpush3.msra.mxu1 %v1773_v44 }
 0xd00   : > { %2819 = vmatmul.mubr.msk.f32.vlgmr.msra.gmra.mrb[16].mxu1 %vm3655_vm10, %v3421_v18  ;;  %2901 = vmatprep.subr.bf16.mxu1 %v3130_v24 }
 0xd01   : > { %2832 = vmatprep.mubr.msk.f32.mxu1 %vm3642_vm1, %v3128_v41  ;;  %2903 = vmatpush3.bf16.msra.mxu1 %v2902_v7  ;;  %v1924_v41 = vld [vmem:[%s3621_s3] sm:$0xff]  ;;  %vm3659_vm1 = vmmov %vm3654_vm9 }
 0xd02   : > { %vm3660_vm14 = vmmov %vm3659_vm1 }
 0xd03   : > { %vm3661_vm15 = vmmov %vm3659_vm1 }
 0xd04   : > { %vm3662_vm3 = vmmov %vm3659_vm1 }
 0xd05   : > { %vm3665_vm5 = vmmov %vm3659_vm1 }
 0xd06   : > { %vm3666_vm6 = vmmov %vm3659_vm1 }
 0xd07   : > { %vm3667_vm7 = vmmov %vm3659_vm1 }
 0xd08   : > { %vm3668_vm8 = vmmov %vm3659_vm1 }
 0xdd3   : > { %v1842_v16 = vpop.f32.mrb[16].mxu1 }
 0xdd4   : > { %v2820_v17 = vpop.f32.mrb[17].mxu1  ;;  %2826 = vmatmul.mubr.msk.f32.vlgmr.msra.gmra.mrb[14].mxu0 %vm3656_vm11, %v1842_v16 }
 0xdd5   : > { %2837 = vmatprep.mubr.msk.f32.mxu0 %vm3659_vm1, %v1924_v41 }
 0xea7   : > { %v1919_v19 = vpop.f32.mrb[14].mxu0 }
 0xea8   : > { %v1920_v20 = vadd.f32 %v1919_v19, %v1849_v46  ;;  %v2827_v21 = vpop.f32.mrb[15].mxu0 }
 0xeaa   : > { %v1923_v18 = vmax.f32 %v1920_v20, 0.0 }
 0xeac   : > { %2833 = vmatmul.mubr.msk.f32.vlgmr.msra.gmra.mrb[18].mxu1 %vm3657_vm12, %v1923_v18 }
 0xead   : > { %2849 = vmatprep.mubr.msk.f32.mxu1 %vm3658_vm13, %v3260_v2 }
 0xf7f   : > { %v1998_v24 = vpop.f32.mrb[18].mxu1 }
 0xf80   : > { %v2834_v26 = vpop.f32.mrb[19].mxu1  ;;  %2835 = vmatprep.subr.mxu0 %v1998_v24 }
 0xf81   : > { %2836 = vmatpush3.msra.mxu0 %v1998_v24 }
 0xf82   : > { %2838 = vmatmul.mubr.msk.f32.vlgmr.msra.gmra.mrb[16].mxu0 %vm3660_vm14, %v1925_v11  ;;  %2840 = vmatprep.subr.mxu0 %v1926_v6 }
 0xf83   : > { %2842 = vmatprep.mubr.msk.f32.mxu0 %vm3661_vm15, %v3358_v12  ;;  %2841 = vmatpush3.msra.mxu0 %v1926_v6  ;;  %v2167_v12 = vrot.slane %v266_v34, %v3280_v10  ;;  %v2408_v10 = vld [vmem:[#allocation2 + $0xb8] sm:$0xff] }
 0xf84   : > { %2859 = vmatprep.subr.mxu0 %v2245_v27 }
 0xf8a   : > { %2843 = vmatmul.mubr.msk.f32.vlgmr.msra.gmra.mrb[16].mxu0 %vm3662_vm3, %v3353_v8 }
 0xf8b   : > { %2860 = vmatpush3.msra.mxu0 %v2245_v27 }
0x105d   : > { %v2844_v30 = vpop.f32.mrb[16].mxu0 }
0x105e   : > { %v2155_v32 = vpop.f32.mrb[17].mxu0 }
0x105f   : > { %v2904_v33 = vpack.c.bf16 %v2844_v30, %v2155_v32 }
0x1061   : > { %2905 = vmatprep.subr.bf16.mxu1 %v2904_v33 }
0x1062   : > { %2907 = vmatpush3.bf16.msra.mxu1 %v2904_v33 }
0x1065   : > { %2850 = vmatmul.mubr.msk.f32.vlgmr.msra.gmra.mrb[20].mxu1 %vm3648_vm0, %v3267_v4 }
0x1066   : > { %2856 = vmatprep.mubr.msk.f32.mxu1 %vm3663_vm2, %v3260_v2 }
0x1138   : > { %v2851_v35 = vpop.f32.mrb[20].mxu1 }
0x1139   : > { %v2240_v36 = vadd.f32 %v2851_v35, %v2167_v12  ;;  %v2234_v8 = vpop.f32.mrb[21].mxu1 }
0x113a   : > { %v2235_v37 = vadd.f32 %v2234_v8, %v2167_v12 }
0x113b   : > { %v2244_v23 = vmax.f32 %v2240_v36, 0.0 }
0x113c   : > { %v2243_v38 = vmax.f32 %v2235_v37, 0.0 }
0x113e   : > { %v2908_v22 = vpack.c.bf16 %v2244_v23, %v2243_v38 }
0x1140   : > { %2909 = vmatprep.subr.bf16.mxu1 %v2908_v22 }
0x1141   : > { %2911 = vmatpush3.bf16.msra.mxu1 %v2908_v22 }
0x1142   : > { %2864 = vmatprep.subr.mxu1 %v2408_v10 }
0x1144   : > { %2857 = vmatmul.mubr.msk.f32.vlgmr.msra.gmra.mrb[22].mxu1 %vm3664_vm4, %v3267_v4 }
0x1145   : > { %2865 = vmatpush3.msra.mxu1 %v2408_v10 }
0x1217   : > { %v2858_v2 = vpop.f32.mrb[22].mxu1 }
0x1218   : > { %v2312_v25 = vpop.f32.mrb[23].mxu1 }
0x1219   : > { %2861 = vmatprep.mubr.msk.f32.mxu0 %vm3665_vm5, %v2312_v25 }
0x121a   : > { %2862 = vmatmul.mubr.msk.f32.vlgmr.msra.gmra.mrb[18].mxu0 %vm3666_vm6, %v2858_v2 }
0x12ed   : > { %v2863_v39 = vpop.f32.mrb[18].mxu0 }
0x12ee   : > { %v2403_v28 = vadd.f32 %v2863_v39, %v2324_v31  ;;  %v2397_v40 = vpop.f32.mrb[19].mxu0 }
0x12ef   : > { %v2398_v4 = vadd.f32 %v2397_v40, %v2324_v31 }
0x12f0   : > { %v2407_v52 = vmax.f32 %v2403_v28, 0.0 }
0x12f1   : > { %v2406_v61 = vmax.f32 %v2398_v4, 0.0 }
0x12f3   : > { %2866 = vmatprep.mubr.msk.f32.mxu1 %vm3667_vm7, %v2406_v61 }
0x12f4   : > { %2867 = vmatmul.mubr.msk.f32.vlgmr.msra.gmra.mrb[24].mxu1 %vm3668_vm8, %v2407_v52 }
0x13c7   : > { %v2868_v48 = vpop.f32.mrb[24].mxu1 }
0x13c8   : > { %v2491_v54 = vadd.f32 %v2868_v48, %v2412_v29  ;;  %v2485_v50 = vpop.f32.mrb[25].mxu1 }
0x13c9   : > { %v2486_v53 = vadd.f32 %v2485_v50, %v2412_v29 }
0x13ca   : > { %2495 = vst [vmem:[%s259_s10 + $0x8] sm:$0xff] %v2491_v54 }
0x13cb   : > { %2494 = vst [vmem:[%s259_s10] sm:$0xff] %v2486_v53 }
0x13cc   : > { %3054 = shalt.err (!%p3051_p7)
}
0x13cd   : > { %s3055_s19 = scalar_lea.hbm %s3575_s16, 256  ;;  %s3059_s28 = scalar_lea.hbm %s3624_s6, 512 }
0x13ce   : > { %p3056_p8 = scmp.ne.s32.totalorder %s3575_s16, %s3055_s19  ;;  %p3060_p1 = scmp.lt.u32.totalorder %s3575_s16, %s3624_s6 }
0x13cf   : > { %p3061_p0 = scmp.lt.u32.totalorder %s3059_s28, %s3055_s19  ;;  %p3063_p6 = scmp.lt.u32.totalorder %s3055_s19, %s3575_s16 }
0x13d0   : > { %p3057_p11 = pnand %p3056_p8, %p3669_p9 }
0x13d1   : > { %p3062_p5 = por %p3061_p0, %p3060_p1 }
0x13d2   : > { %p3058_p13 = pneg %p3057_p11 }
0x13d3   : > { %p3064_p10 = por %p3063_p6, %p3062_p5 }
0x13d5   : > { %p3065_p12 = pnand %p3064_p10, %p3058_p13 }
0x13d7   : > { %3068 = shalt.err (!%p3065_p12)
}
0x13d8   : > { %s3132_s14 = smov 128   ;;  %s3133_s15 = smov 8  }
0x13d9   : > { %2920 = dma.vmem_to_hbm [thread:$0]  (%p3669_p9), %s3570_s13, 256, %s3575_s16, %s3577_s9, %s3132_s14, %s3132_s14, %s3133_s15  }
0x13da PF: > { %p2932_p2 = scmp.ge.s32.totalorder %s3107_s24, 2  ;;  %s2525_s12 = sand.u32 1, %s3095_s21  }
0x13db   : > { %p3670_p3 = scmp.ne.s32.totalorder %s3635_s8, 0  ;;  %s2526_s11 = scalar_lea.sflag [#allocation4], %s2525_s12 }
0x13dd   : > { %p2927_p4 = pnand %p2932_p2, %p3670_p3 }
0x13df   : > { %3090 = dma.done.wait (!%p2927_p4), %s2526_s11, 256  }
0x13e0   : > { %3092 = vsyncadd (!%p2927_p4), %s2526_s11, 4294967040  ;;  %p17_p7 = scmp.ge.s32.totalorder %s3194_s27, 4   ;;  %s3671_s21 = smov %s3099_s22 }
0x13e1   : > { %s3672_s22 = smov %s3103_s23  ;;  %s3673_s23 = smov %s3205_s30 }
0x13e2   : > { %s3674_s24 = smov %s3194_s27  ;;  %19 = sbr.rel (!%p17_p7) target bundleno = 4 (0x4), region = 84 }
0x13e9   :  { %2531 = vsyncpa [#allocation3], 1 }
0x13ea   :  { %2533 = vsyncpa [#allocation3 + $0x1], 1 }
0x13eb   :  { %2534 = vsyncpa [#allocation4], 1 }
0x13ec   :  { %2536 = vsyncpa [#allocation4 + $0x1], 1 }

</bundles_post_ra>
